<compile_context>
chip_gen: v7x
topology: tpu7x:2x2x1
jax: 0.10.0
libtpu: 0.0.40
codegen_flags: <defaults>
</compile_context>

<pallas_src>
import functools

import jax
import jax.numpy as jnp
from jax.experimental import pallas as pl
from jax.experimental.pallas import tpu as pltpu

_VMEM_LIMIT = 32 * 1024 * 1024   # plenty for these tiles, safe on v5e/v6e/v7x
_NEG_INF = -1e30                 # large negative instead of -inf; exp() underflows to 0


def _round_up(x, m):
    return pl.cdiv(x, m) * m


def _pick_tile(dim, candidates):
    for c in candidates:
        if dim % c == 0:
            return c
    return dim


# ----------------------- exact GELU (erf form, like nn.GELU()) -----------------------
def _erf(x):
    # Abramowitz & Stegun 7.1.26 rational approximation, |error| <= 1.5e-7.
    # Only abs / mul / add / div / exp / where -> lowers on every TPU generation.
    p = 0.3275911
    a1, a2, a3, a4, a5 = (0.254829592, -0.284496736, 1.421413741,
                          -1.453152027, 1.061405429)
    ax = jnp.abs(x)
    t = 1.0 / (1.0 + p * ax)
    poly = ((((a5 * t + a4) * t + a3) * t + a2) * t + a1) * t
    y = 1.0 - poly * jnp.exp(-ax * ax)
    return jnp.where(x < 0.0, -y, y)


def _gelu_exact(x):
    return 0.5 * x * (1.0 + _erf(x * 0.7071067811865476))


def _layernorm_f32(x, g, b, eps):
    # x: (rows, d) float32; matches nn.LayerNorm (biased variance, eps in rsqrt).
    mean = jnp.mean(x, axis=-1, keepdims=True)
    mean_sq = jnp.mean(x * x, axis=-1, keepdims=True)
    var = jnp.maximum(mean_sq - mean * mean, 0.0)
    inv = jax.lax.rsqrt(var + eps)
    return (x - mean) * (inv * g) + b


# --------------------- LN fused into a matmul:  y = LN(x) @ W (+ b) ---------------------
def _ln_matmul_kernel(x_ref, g_ref, b_ref, w_ref, *rest, eps, has_bias):
    bias_ref = rest[0] if has_bias else None
    o_ref = rest[-1]

    x = x_ref[...].astype(jnp.float32)
    xn = _layernorm_f32(x, g_ref[...].astype(jnp.float32),
                        b_ref[...].astype(jnp.float32), eps)
    y = jnp.dot(xn.astype(x_ref.dtype), w_ref[...],
                preferred_element_type=jnp.float32)
    if has_bias:
        y = y + bias_ref[...].astype(jnp.float32)
    o_ref[...] = y.astype(o_ref.dtype)


def ln_matmul(x2d, gamma, beta, w, bias=None, *, eps=1e-5, tm=256, tn=256):
    # K (= d_model) is kept un-tiled so LN can be computed in-kernel.
    # TODO(synk): for very large d_model a K-tiled path with a separate LN pass is needed.
    m, d = x2d.shape
    d2, n = w.shape
    assert d == d2 and d % 128 == 0 and n % 128 == 0
    tn = _pick_tile(n, (tn, 256, 128))
    tm = min(tm, _round_up(m, 8))
    m_p = _round_up(m, tm)
    xp = jnp.pad(x2d, ((0, m_p - m), (0, 0))) if m_p != m else x2d

    has_bias = bias is not None
    in_specs = [
        pl.BlockSpec((tm, d), lambda i, j: (i, 0)),
        pl.BlockSpec((1, d), lambda i, j: (0, 0)),
        pl.BlockSpec((1, d), lambda i, j: (0, 0)),
        pl.BlockSpec((d, tn), lambda i, j: (0, j)),
    ]
    args = [xp, gamma.reshape(1, d), beta.reshape(1, d), w]
    if has_bias:
        in_specs.append(pl.BlockSpec((1, tn), lambda i, j: (0, j)))
        args.append(bias.reshape(1, n))

    out = pl.pallas_call(
        functools.partial(_ln_matmul_kernel, eps=eps, has_bias=has_bias),
        out_shape=jax.ShapeDtypeStruct((m_p, n), x2d.dtype),
        grid_spec=pltpu.PrefetchScalarGridSpec(
            num_scalar_prefetch=0,
            grid=(m_p // tm, n // tn),
            in_specs=in_specs,
            out_specs=pl.BlockSpec((tm, tn), lambda i, j: (i, j)),
        ),
        compiler_params=pltpu.CompilerParams(
            dimension_semantics=("parallel", "parallel"),
            vmem_limit_bytes=_VMEM_LIMIT,
        ),
    )(*args)
    return out[:m] if m_p != m else out


# ------------- LN fused into the MLP up path:  gelu(LN(x)@Wg) * (LN(x)@Wu) -------------
def _ln_gate_up_kernel(x_ref, g_ref, b_ref, wg_ref, wu_ref, o_ref, *, eps):
    x = x_ref[...].astype(jnp.float32)
    xn = _layernorm_f32(x, g_ref[...].astype(jnp.float32),
                        b_ref[...].astype(jnp.float32), eps)
    xn_c = xn.astype(x_ref.dtype)
    yg = jnp.dot(xn_c, wg_ref[...], preferred_element_type=jnp.float32)
    yu = jnp.dot(xn_c, wu_ref[...], preferred_element_type=jnp.float32)
    o_ref[...] = (_gelu_exact(yg) * yu).astype(o_ref.dtype)


def ln_gate_up(x2d, gamma, beta, w_gate, w_up, *, eps=1e-5, tm=256, tn=512):
    m, d = x2d.shape
    _, n = w_gate.shape
    assert w_up.shape == (d, n)
    assert d % 128 == 0 and n % 128 == 0
    tn = _pick_tile(n, (tn, 256, 128))
    tm = min(tm, _round_up(m, 8))
    m_p = _round_up(m, tm)
    xp = jnp.pad(x2d, ((0, m_p - m), (0, 0))) if m_p != m else x2d

    out = pl.pallas_call(
        functools.partial(_ln_gate_up_kernel, eps=eps),
        out_shape=jax.ShapeDtypeStruct((m_p, n), x2d.dtype),
        grid_spec=pltpu.PrefetchScalarGridSpec(
            num_scalar_prefetch=0,
            grid=(m_p // tm, n // tn),
            in_specs=[
                pl.BlockSpec((tm, d), lambda i, j: (i, 0)),
                pl.BlockSpec((1, d), lambda i, j: (0, 0)),
                pl.BlockSpec((1, d), lambda i, j: (0, 0)),
                pl.BlockSpec((d, tn), lambda i, j: (0, j)),
                pl.BlockSpec((d, tn), lambda i, j: (0, j)),
            ],
            out_specs=pl.BlockSpec((tm, tn), lambda i, j: (i, j)),
        ),
        compiler_params=pltpu.CompilerParams(
            dimension_semantics=("parallel", "parallel"),
            vmem_limit_bytes=_VMEM_LIMIT,
        ),
    )(xp, gamma.reshape(1, d), beta.reshape(1, d), w_gate, w_up)
    return out[:m] if m_p != m else out


# --------------------- MXU matmul with fused bias / residual epilogue ---------------------
def _matmul_kernel(x_ref, w_ref, *rest, has_bias, has_residual):
    idx = 0
    b_ref = rest[idx] if has_bias else None
    idx += int(has_bias)
    r_ref = rest[idx] if has_residual else None
    idx += int(has_residual)
    o_ref, acc_ref = rest[idx], rest[idx + 1]

    k = pl.program_id(2)

    @pl.when(k == 0)
    def _():
        acc_ref[...] = jnp.zeros_like(acc_ref)

    acc_ref[...] += jnp.dot(x_ref[...], w_ref[...],
                            preferred_element_type=jnp.float32)

    @pl.when(k == pl.num_programs(2) - 1)
    def _():
        y = acc_ref[...]
        if has_bias:
            y = y + b_ref[...].astype(jnp.float32)
        if has_residual:
            y = y + r_ref[...].astype(jnp.float32)
        o_ref[...] = y.astype(o_ref.dtype)


def matmul_fused(x, w, bias=None, residual=None, *, tm=256, tn=256, tk=512):
    m, kdim = x.shape
    k2, n = w.shape
    assert kdim == k2
    assert n % 128 == 0 and kdim % 128 == 0, "matmul dims must be multiples of 128"
    tn = _pick_tile(n, (tn, 256, 128))
    tk = _pick_tile(kdim, (tk, 256, 128))
    tm = min(tm, _round_up(m, 8))
    m_p = _round_up(m, tm)
    if m_p != m:
        x = jnp.pad(x, ((0, m_p - m), (0, 0)))
        if residual is not None:
            residual = jnp.pad(residual, ((0, m_p - m), (0, 0)))

    has_bias = bias is not None
    has_residual = residual is not None

    in_specs = [
        pl.BlockSpec((tm, tk), lambda i, j, k: (i, k)),
        pl.BlockSpec((tk, tn), lambda i, j, k: (k, j)),
    ]
    args = [x, w]
    if has_bias:
        in_specs.append(pl.BlockSpec((1, tn), lambda i, j, k: (0, j)))
        args.append(bias.reshape(1, n))
    if has_residual:
        in_specs.append(pl.BlockSpec((tm, tn), lambda i, j, k: (i, j)))
        args.append(residual)

    out = pl.pallas_call(
        functools.partial(_matmul_kernel, has_bias=has_bias,
                          has_residual=has_residual),
        out_shape=jax.ShapeDtypeStruct((m_p, n), x.dtype),
        grid_spec=pltpu.PrefetchScalarGridSpec(
            num_scalar_prefetch=0,
            grid=(m_p // tm, n // tn, kdim // tk),
            in_specs=in_specs,
            out_specs=pl.BlockSpec((tm, tn), lambda i, j, k: (i, j)),
            scratch_shapes=[pltpu.VMEM((tm, tn), jnp.float32)],
        ),
        compiler_params=pltpu.CompilerParams(
            dimension_semantics=("parallel", "parallel", "arbitrary"),
            vmem_limit_bytes=_VMEM_LIMIT,
        ),
    )(*args)
    return out[:m] if m_p != m else out


# -------- causal attention (all heads) + output projection + residual, per batch --------
def _attn_proj_kernel(qkv_ref, wo_ref, bo_ref, res_ref, o_ref, attn_scr,
                      *, n_heads, d_head, scale):
    seq = qkv_ref.shape[1]
    d_model = n_heads * d_head

    row = jax.lax.broadcasted_iota(jnp.int32, (seq, seq), 0)
    col = jax.lax.broadcasted_iota(jnp.int32, (seq, seq), 1)
    causal = col <= row

    # Heads unrolled statically; per-head q/k/v are static lane-aligned slices of the
    # in-VMEM qkv block, so no extra DMA and no relayout.
    for h in range(n_heads):
        q = qkv_ref[0, :, h * d_head:(h + 1) * d_head].astype(jnp.float32)
        k = qkv_ref[0, :, d_model + h * d_head:d_model + (h + 1) * d_head].astype(jnp.float32)
        v = qkv_ref[0, :, 2 * d_model + h * d_head:2 * d_model + (h + 1) * d_head].astype(jnp.float32)

        # logits = q @ k^T on the MXU
        s = jax.lax.dot_general(q, k, (((1,), (1,)), ((), ())),
                                preferred_element_type=jnp.float32)
        # masked_fill(tril==0, -inf) then / sqrt(d_model) == scale unmasked values only
        s = jnp.where(causal, s * scale, _NEG_INF)
        m = jnp.max(s, axis=-1, keepdims=True)
        p = jnp.exp(s - m)
        p = p * pl.reciprocal(jnp.sum(p, axis=-1, keepdims=True), approx=True)
        attn_scr[:, h * d_head:(h + 1) * d_head] = jnp.dot(
            p, v, preferred_element_type=jnp.float32)

    # output projection + bias + first residual, all in VMEM
    o = jnp.dot(attn_scr[...], wo_ref[...], preferred_element_type=jnp.float32)
    o = o + bo_ref[...].astype(jnp.float32) + res_ref[0].astype(jnp.float32)
    o_ref[0] = o.astype(o_ref.dtype)


def attention_proj(qkv, w_o, b_o, x_res, *, n_heads, scale):
    # qkv: (batch, seq, 3*d_model) laid out as [Q heads | K heads | V heads].
    # Full-sequence blocks are fine up to the module's MAX_SEQ_LEN=1024
    # ((1024,1024) f32 scores = 4 MiB); a flash-style KV-tiled kernel is needed beyond.
    batch, seq, three_d = qkv.shape
    d_model = three_d // 3
    d_head = d_model // n_heads
    assert d_model % n_heads == 0
    assert d_head % 128 == 0, "head dim must be lane-dense (multiple of 128)"  # TODO(synk): relax
    assert seq % 8 == 0

    return pl.pallas_call(
        functools.partial(_attn_proj_kernel, n_heads=n_heads, d_head=d_head,
                          scale=scale),
        out_shape=jax.ShapeDtypeStruct((batch, seq, d_model), x_res.dtype),
        grid_spec=pltpu.PrefetchScalarGridSpec(
            num_scalar_prefetch=0,
            grid=(batch,),
            in_specs=[
                pl.BlockSpec((1, seq, three_d), lambda b: (b, 0, 0)),
                pl.BlockSpec((d_model, d_model), lambda b: (0, 0)),
                pl.BlockSpec((1, d_model), lambda b: (0, 0)),
                pl.BlockSpec((1, seq, d_model), lambda b: (b, 0, 0)),
            ],
            out_specs=pl.BlockSpec((1, seq, d_model), lambda b: (b, 0, 0)),
            scratch_shapes=[pltpu.VMEM((seq, d_model), jnp.float32)],
        ),
        compiler_params=pltpu.CompilerParams(
            dimension_semantics=("parallel",),
            vmem_limit_bytes=_VMEM_LIMIT,
        ),
    )(qkv, w_o, b_o.reshape(1, d_model), x_res)


# ------------------------------------ EncoderBlock ------------------------------------
def encoder_block(x, params, *, n_heads, eps=1e-5):
    batch, seq, d_model = x.shape
    rows = batch * seq
    x2d = x.reshape(rows, d_model)

    # LN1 fused into the packed QKV projection (one matmul kernel)
    qkv = ln_matmul(x2d, params["ln1_g"], params["ln1_b"],
                    params["w_qkv"], params["b_qkv"], eps=eps)
    qkv = qkv.reshape(batch, seq, 3 * d_model)

    # causal attention (all heads) + output projection + bias + first residual, per batch
    hidden1 = attention_proj(qkv, params["w_o"], params["b_o"], x,
                             n_heads=n_heads, scale=1.0 / (d_model ** 0.5))
    hidden1_2d = hidden1.reshape(rows, d_model)

    # LN2 fused into gelu(h@Wg)*(h@Wu)
    inter = ln_gate_up(hidden1_2d, params["ln2_g"], params["ln2_b"],
                       params["w_gate"], params["w_up"], eps=eps)

    # down projection with second residual fused into the epilogue
    out = matmul_fused(inter, params["w_down"], residual=hidden1_2d)
    return out.reshape(batch, seq, d_model)


# -------------------------------------- self test --------------------------------------
def _reference(x, params, n_heads, eps=1e-5):
    batch, seq, d_model = x.shape
    d_head = d_model // n_heads

    def ln(v, g, b):
        mu = jnp.mean(v, axis=-1, keepdims=True)
        var = jnp.mean((v - mu) ** 2, axis=-1, keepdims=True)
        return (v - mu) / jnp.sqrt(var + eps) * g + b

    h = ln(x, params["ln1_g"], params["ln1_b"])
    qkv = h @ params["w_qkv"] + params["b_qkv"]
    q, k, v = jnp.split(qkv, 3, axis=-1)

    def heads(t):
        return t.reshape(batch, seq, n_heads, d_head).transpose(0, 2, 1, 3)

    qh, kh, vh = heads(q), heads(k), heads(v)
    att = jnp.einsum("bhqd,bhkd->bhqk", qh, kh)
    causal = jnp.tril(jnp.ones((seq, seq), dtype=bool))
    att = jnp.where(causal[None, None], att, -jnp.inf)
    att = att / (d_model ** 0.5)
    att = jax.nn.softmax(att, axis=-1)
    oh = jnp.einsum("bhqk,bhkd->bhqd", att, vh)
    o = oh.transpose(0, 2, 1, 3).reshape(batch, seq, d_model)
    o = o @ params["w_o"] + params["b_o"]
    hidden1 = x + o
    h2 = ln(hidden1, params["ln2_g"], params["ln2_b"])
    inter = jax.nn.gelu(h2 @ params["w_gate"], approximate=False) * (h2 @ params["w_up"])
    return inter @ params["w_down"] + hidden1


if __name__ == "__main__":
    # Small but lane-dense shapes: d_model=256 (2 heads of d_head=128), seq=128.
    batch, seq, d_model, n_heads = 2, 128, 256, 2
    inter = 4 * d_model

    key = jax.random.PRNGKey(0)
    ks = jax.random.split(key, 8)
    x = jax.random.normal(ks[0], (batch, seq, d_model), jnp.float32)

    s_d = 1.0 / (d_model ** 0.5)
    s_i = 1.0 / (inter ** 0.5)
    params = {
        "ln1_g": jnp.ones((d_model,), jnp.float32),
        "ln1_b": jnp.zeros((d_model,), jnp.float32),
        "ln2_g": jnp.ones((d_model,), jnp.float32),
        "ln2_b": jnp.zeros((d_model,), jnp.float32),
        # Linear weights stored as (in, out) == torch weight transposed.
        # QKV packs the per-head q/k/v Linears as [Q heads | K heads | V heads].
        "w_qkv": jax.random.normal(ks[1], (d_model, 3 * d_model), jnp.float32) * s_d,
        "b_qkv": jax.random.normal(ks[2], (3 * d_model,), jnp.float32) * 0.02,
        "w_o": jax.random.normal(ks[3], (d_model, d_model), jnp.float32) * s_d,
        "b_o": jax.random.normal(ks[4], (d_model,), jnp.float32) * 0.02,
        "w_gate": jax.random.normal(ks[5], (d_model, inter), jnp.float32) * s_d,
        "w_up": jax.random.normal(ks[6], (d_model, inter), jnp.float32) * s_d,
        "w_down": jax.random.normal(ks[7], (inter, d_model), jnp.float32) * s_i,
    }

    y = encoder_block(x, params, n_heads=n_heads)
    y = jax.block_until_ready(y)

    ref = _reference(x, params, n_heads)
    assert y.shape == ref.shape
    assert bool(jnp.all(jnp.isfinite(y))), "non-finite output"
    assert jnp.allclose(y, ref, atol=5e-2, rtol=5e-2), "mismatch vs reference"
    print("KERNEL_OK")
</pallas_src>

<mosaic_0001>
module attributes {stable_mosaic.version = 11 : i64} {
  func.func @_ln_matmul_kernel(%arg0: i32, %arg1: i32, %arg2: memref<256x256xf32, #tpu.memory_space<vmem>>, %arg3: memref<1x256xf32, #tpu.memory_space<vmem>>, %arg4: memref<1x256xf32, #tpu.memory_space<vmem>>, %arg5: memref<256x256xf32, #tpu.memory_space<vmem>>, %arg6: memref<1x256xf32, #tpu.memory_space<vmem>>, %arg7: memref<256x256xf32, #tpu.memory_space<vmem>>) attributes {dimension_semantics = [#tpu.dimension_semantics<parallel>, #tpu.dimension_semantics<parallel>], iteration_bounds = array<i64: 1, 3>, scalar_prefetch = 0 : i64, scratch_operands = 0 : i64, tpu.core_type = #tpu.core_type<tc>, window_params = [{transform_indices = @transform_0, window_bounds = array<i64: 256, 256>}, {pipeline_mode = #tpu.pipeline_mode<synchronous>, transform_indices = @transform_1, window_bounds = array<i64: 1, 256>}, {pipeline_mode = #tpu.pipeline_mode<synchronous>, transform_indices = @transform_2, window_bounds = array<i64: 1, 256>}, {transform_indices = @transform_3, window_bounds = array<i64: 256, 256>}, {transform_indices = @transform_4, window_bounds = array<i64: 1, 256>}, {transform_indices = @transform_5, window_bounds = array<i64: 256, 256>}]} {
    %c0 = arith.constant 0 : index
    %c0_0 = arith.constant 0 : index
    %0 = vector.load %arg2[%c0, %c0_0] : memref<256x256xf32, #tpu.memory_space<vmem>>, vector<256x256xf32>
    %c0_1 = arith.constant 0 : index
    %c0_2 = arith.constant 0 : index
    %1 = vector.load %arg3[%c0_1, %c0_2] : memref<1x256xf32, #tpu.memory_space<vmem>>, vector<1x256xf32>
    %c0_3 = arith.constant 0 : index
    %c0_4 = arith.constant 0 : index
    %2 = vector.load %arg4[%c0_3, %c0_4] : memref<1x256xf32, #tpu.memory_space<vmem>>, vector<1x256xf32>
    %cst = arith.constant dense<0.000000e+00> : vector<256xf32>
    %3 = vector.multi_reduction <add>, %0, %cst [1] : vector<256x256xf32> to vector<256xf32>
    %4 = vector.shape_cast %3 : vector<256xf32> to vector<256x1xf32>
    %cst_5 = arith.constant 2.560000e+02 : f32
    %5 = vector.broadcast %cst_5 : f32 to vector<256x1xf32>
    %6 = arith.divf %4, %5 : vector<256x1xf32>
    %7 = arith.mulf %0, %0 : vector<256x256xf32>
    %cst_6 = arith.constant dense<0.000000e+00> : vector<256xf32>
    %8 = vector.multi_reduction <add>, %7, %cst_6 [1] : vector<256x256xf32> to vector<256xf32>
    %9 = vector.shape_cast %8 : vector<256xf32> to vector<256x1xf32>
    %cst_7 = arith.constant 2.560000e+02 : f32
    %10 = vector.broadcast %cst_7 : f32 to vector<256x1xf32>
    %11 = arith.divf %9, %10 : vector<256x1xf32>
    %12 = arith.mulf %6, %6 : vector<256x1xf32>
    %13 = arith.subf %11, %12 : vector<256x1xf32>
    %cst_8 = arith.constant 0.000000e+00 : f32
    %14 = vector.broadcast %cst_8 : f32 to vector<256x1xf32>
    %15 = arith.maximumf %13, %14 : vector<256x1xf32>
    %cst_9 = arith.constant 9.99999974E-6 : f32
    %16 = vector.broadcast %cst_9 : f32 to vector<256x1xf32>
    %17 = arith.addf %15, %16 : vector<256x1xf32>
    %18 = math.rsqrt %17 : vector<256x1xf32>
    %19 = vector.broadcast %6 : vector<256x1xf32> to vector<256x256xf32>
    %20 = arith.subf %0, %19 : vector<256x256xf32>
    %21 = vector.broadcast %18 : vector<256x1xf32> to vector<256x256xf32>
    %22 = vector.broadcast %1 : vector<1x256xf32> to vector<256x256xf32>
    %23 = arith.mulf %21, %22 : vector<256x256xf32>
    %24 = arith.mulf %20, %23 : vector<256x256xf32>
    %25 = vector.broadcast %2 : vector<1x256xf32> to vector<256x256xf32>
    %26 = arith.addf %24, %25 : vector<256x256xf32>
    %c0_10 = arith.constant 0 : index
    %c0_11 = arith.constant 0 : index
    %27 = vector.load %arg5[%c0_10, %c0_11] : memref<256x256xf32, #tpu.memory_space<vmem>>, vector<256x256xf32>
    %cst_12 = arith.constant dense<0.000000e+00> : vector<256x256xf32>
    %28 = tpu.matmul %26, %27, %cst_12 {dimension_numbers = #tpu.dot_dimension_numbers<[1], [0], [0], [1], [0, 0, 1, 1], [], []>} : vector<256x256xf32>, vector<256x256xf32>, vector<256x256xf32> -> vector<256x256xf32>
    %c0_13 = arith.constant 0 : index
    %c0_14 = arith.constant 0 : index
    %29 = vector.load %arg6[%c0_13, %c0_14] : memref<1x256xf32, #tpu.memory_space<vmem>>, vector<1x256xf32>
    %30 = vector.broadcast %29 : vector<1x256xf32> to vector<256x256xf32>
    %31 = arith.addf %28, %30 : vector<256x256xf32>
    %c0_15 = arith.constant 0 : index
    %c0_16 = arith.constant 0 : index
    %32 = vector.load %arg7[%c0_15, %c0_16] : memref<256x256xf32, #tpu.memory_space<vmem>>, vector<256x256xf32>
    tpu.vector_store %arg7[%c0_15, %c0_16], %31 {strides = array<i32>} : memref<256x256xf32, #tpu.memory_space<vmem>>, vector<256x256xf32>,
    return
  }
  func.func @transform_0(%arg0: i32, %arg1: i32) -> (i32, i32) {
    %c0_i32 = arith.constant 0 : i32
    %c0_i32_0 = arith.constant 0 : i32
    return %arg0, %c0_i32 : i32, i32
  }
  func.func @transform_1(%arg0: i32, %arg1: i32) -> (i32, i32) {
    %c0_i32 = arith.constant 0 : i32
    %c0_i32_0 = arith.constant 0 : i32
    %c0_i32_1 = arith.constant 0 : i32
    return %c0_i32, %c0_i32_0 : i32, i32
  }
  func.func @transform_2(%arg0: i32, %arg1: i32) -> (i32, i32) {
    %c0_i32 = arith.constant 0 : i32
    %c0_i32_0 = arith.constant 0 : i32
    %c0_i32_1 = arith.constant 0 : i32
    return %c0_i32, %c0_i32_0 : i32, i32
  }
  func.func @transform_3(%arg0: i32, %arg1: i32) -> (i32, i32) {
    %c0_i32 = arith.constant 0 : i32
    %c0_i32_0 = arith.constant 0 : i32
    return %c0_i32, %arg1 : i32, i32
  }
  func.func @transform_4(%arg0: i32, %arg1: i32) -> (i32, i32) {
    %c0_i32 = arith.constant 0 : i32
    %c0_i32_0 = arith.constant 0 : i32
    return %c0_i32, %arg1 : i32, i32
  }
  func.func @transform_5(%arg0: i32, %arg1: i32) -> (i32, i32) {
    %c0_i32 = arith.constant 0 : i32
    return %arg0, %arg1 : i32, i32
  }
}

</mosaic_0001>

<bundles_post_ra>
// kernel: tpu_custom_call.1
= control target key start
LH: loop header
LB: loop body
LE: loop exit
PB: predicated region body
PF: predicated region fallthrough
CT: control target
= control target key end

     0   :  { %10 = vsyncpa [#allocation3], 0  ;;  %s2957_s0 = inlined_call_operand.hbm [shape: f32[256,256], index: 0, kind: input, shape index: {}]   ;;  %s2958_s1 = inlined_call_operand.vmem [shape: f32[1,256], index: 1, kind: input, shape index: {}]   ;;  %s2959_s2 = inlined_call_operand.vmem [shape: f32[1,256], index: 2, kind: input, shape index: {}]   ;;  %s2960_s3 = inlined_call_operand.hbm [shape: f32[256,768], index: 3, kind: input, shape index: {}]   ;;  %s2961_s4 = inlined_call_operand.vmem [shape: f32[1,768], index: 4, kind: input, shape index: {}]   ;;  %s2962_s5 = inlined_call_operand.hbm [shape: f32[256,768], index: 5, kind: output, shape index: {}]  }
   0x1   :  { %11 = vsyncpa [#allocation6], 0 }
   0x2   :  { %13 = vsyncpa [#allocation6 + $0x1], 0 }
   0x3   :  { %14 = vsyncpa [#allocation4], 0 }
   0x4   :  { %16 = vsyncpa [#allocation4 + $0x1], 0  ;;  %s2152_s18 = smov 0   ;;  %s2154_s19 = smov 0  }
   0x5   :  { %s2156_s20 = smov 0   ;;  %s2158_s21 = smov 0  }
   0x6   :  { %s2160_s22 = smov 0   ;;  %s2162_s23 = smov 0  }
   0x7 LB: > { %s1650_s24 = sadd.s32 4294967295, %s2111_s23   ;;  %s1651_s25 = sadd.s32 4294967294, %s2111_s23   ;;  %s2111_s23 = sphi %s2162_s23, %s22_s23   ;;  %s2107_s22 = sphi %s2160_s22, %s2994_s22   ;;  %s2103_s21 = sphi %s2158_s21, %s2993_s21   ;;  %s2099_s20 = sphi %s2156_s20, %s2992_s20   ;;  %s2095_s19 = sphi %s2154_s19, %s2991_s19   ;;  %s2091_s18 = sphi %s2152_s18, %s2990_s18  }
   0x8   : > { %p116_p0 = scmp.ne.s32.totalorder %s2099_s20, %s2095_s19  ;;  %p117_p1 = scmp.eq.s32.totalorder %s2111_s23, 0 }
   0x9   : > { %p122_p2 = scmp.ne.s32.totalorder %s2095_s19, %s2091_s18  ;;  %p2189_p3 = scmp.eq.s32.totalorder %s1650_s24, 0 }
   0xa   : > { %p2193_p4 = por %p117_p1, %p116_p0  ;;  %p174_p5 = scmp.eq.s32.totalorder %s1650_s24, 2 }
   0xb   : > { %s2972_s26 = scalar_select %p2189_p3, 1, 0 }
   0xc   : > { %p2199_p6 = por %p2189_p3, %p122_p2  ;;  %p180_p7 = scmp.eq.s32.totalorder %s1651_s25, 2 }
   0xd   : > { %p2203_p8 = por %p174_p5, %p116_p0  ;;  %p1652_p9 = scmp.ge.s32.totalorder %s2111_s23, 1 }
   0xe   : > { %s2974_s28 = scalar_select %p2199_p6, 1, 0 }
   0xf   : > { %s2975_s29 = scalar_select %p2203_p8, 1, 0 }
  0x10   : > { %p2208_p10 = por %p180_p7, %p122_p2  ;;  %p187_p11 = scmp.lt.s32.totalorder %s2111_s23, 4 }
  0x11   : > { %s2113_s7 = smov [#allocation2]   ;;  %p1787_p0 = scmp.lt.s32.totalorder %s2111_s23, 3 }
  0x12   : > { %s2976_s30 = scalar_select %p2208_p10, 1, 0 }
  0x13   : > { %p2213_p12 = pnand %p1652_p9, %p187_p11  ;;  %s203_s8 = sshll.u32 %s2113_s7, 4  ;;  %s204_s8 = int_to_ptr.vmem [resolvable:$true] %s203_s8 }
  0x14   : > { %2977 = sst [smem:[#allocation11_spill]] %s2976_s30  ;;  %p2228_p2 = pnand %p1787_p0, %p2193_p4 }
  0x15   : > { %s2978_s6 = scalar_select %p2213_p12, 1, 0 }
  0x16   : > { %p1774_p13 = pneg %p2213_p12  ;;  %s31_s11 = sadd.s32 1, %s2107_s22 }
  0x17   : > { %s2980_s10 = scalar_select %p2228_p2, 1, 0 }
  0x18   : > { %p2222_p1 = pnand %p1774_p13, %p2189_p3  ;;  %s1967_s14 = scalar_lea.hbm %s2957_s0, 8192 }
  0x19   : > { %p1968_p5 = scmp.ne.s32.totalorder %s2957_s0, %s1967_s14  ;;  %p1974_p4 = scmp.lt.u32.totalorder %s1967_s14, %s2957_s0 }
  0x1a   : > { %p1969_p7 = pneg %p2222_p1 }
  0x1c   : > { %p1970_p9 = pnand %p1969_p7, %p1968_p5 }
  0x1e   : > { %p1971_p11 = pneg %p1970_p9 }
  0x20   : > { %p1976_p13 = pnand %p1974_p4, %p1971_p11 }
  0x22   : > { %1979 = shalt.err (!%p1976_p13)
}
  0x23   : > { %s1980_s25 = scalar_lea.vmem %s204_s8, 8192  ;;  %p1988_p6 = scmp.lt.s32.totalorder %s204_s8, %s204_s8 }
  0x24   : > { %p1981_p0 = scmp.ne.s32.totalorder %s204_s8, %s1980_s25  ;;  %p1989_p3 = scmp.lt.s32.totalorder %s1980_s25, %s1980_s25 }
  0x26   : > { %p1983_p10 = pnand %p1981_p0, %p1969_p7  ;;  %p1990_p12 = por %p1989_p3, %p1988_p6 }
  0x28   : > { %p1984_p8 = pneg %p1983_p10 }
  0x2a   : > { %p1991_p2 = pnand %p1990_p12, %p1984_p8 }
  0x2c   : > { %1994 = shalt.err (!%p1991_p2)
}
  0x2d   : > { %s2970_s27 = smov 256   ;;  %s2971_s7 = smov 16  }
  0x2e   : > { %1777 = dma.hbm_to_vmem [thread:$0]  (!%p2222_p1), %s2957_s0, 8192, %s204_s8, [#allocation3], %s2970_s27, %s2970_s27, %s2971_s7  }
  0x2f   : > { %p32_p10 = scmp.ge.s32.totalorder %s31_s11, 3  ;;  %s109_s14 = sadd.s32 1, %s2099_s20 }
  0x30   : > { %s223_s15 = sand.u32 1, %s2099_s20   ;;  %s1668_s24 = sshll.u32 %s2107_s22, 8 }
  0x31   : > { %s2996_s11 = smov (%p32_p10, %s31_s11), 0  ;;  %s1655_s16 = sshll.u32 %s223_s15, 9 }
  0x32   : > { %s106_s17 = ssub.s32 %s2107_s22, %s2996_s11  ;;  %s2262_s30 = scalar_lea.hbm %s2960_s3, %s1668_s24 }
  0x33   : > { %p107_p3 = scmp.eq.s32.totalorder %s106_s17, 0  ;;  %s227_s8 = scalar_lea.vmem [#allocation5], %s1655_s16 }
  0x34   : > { %s234_s12 = sshll.u32 %s227_s8, 4  ;;  %s2269_s27 = scalar_lea.sflag [#allocation6], %s223_s15  ;;  %s2267_s12 = int_to_ptr.vmem [resolvable:$true] %s234_s12 }
  0x35   : > { %s2265_s13 = scalar_select %p107_p3, %s2099_s20, %s109_s14  }
  0x36   : > { %s1995_s7 = scalar_lea.hbm %s2262_s30, 8192  ;;  %p2981_p8 = scmp.ne.s32.totalorder %s2980_s10, 0 }
  0x37   : > { %p1996_p6 = scmp.ne.s32.totalorder %s2262_s30, %s1995_s7  ;;  %s2000_s9 = scalar_lea.hbm %s2960_s3, 24576 }
  0x38   : > { %p1997_p12 = pneg %p2981_p8  ;;  %p2001_p5 = scmp.lt.u32.totalorder %s2262_s30, %s2960_s3 }
  0x39   : > { %p2002_p7 = scmp.lt.u32.totalorder %s2000_s9, %s1995_s7  ;;  %p2004_p11 = scmp.lt.u32.totalorder %s1995_s7, %s2262_s30 }
  0x3a   : > { %p1998_p1 = pnand %p1997_p12, %p1996_p6 }
  0x3b   : > { %p2003_p9 = por %p2002_p7, %p2001_p5 }
  0x3c   : > { %p1999_p2 = pneg %p1998_p1 }
  0x3d   : > { %p2005_p4 = por %p2004_p11, %p2003_p9 }
  0x3f   : > { %p2006_p13 = pnand %p2005_p4, %p1999_p2 }
  0x41   : > { %2009 = shalt.err (!%p2006_p13)
}
  0x42   : > { %s2010_s14 = scalar_lea.vmem %s2267_s12, 8192  ;;  %s2116_s15 = smov [#allocation5]  }
  0x43   : > { %p2011_p0 = scmp.ne.s32.totalorder %s2267_s12, %s2010_s14  ;;  %s2015_s8 = sshll.u32 %s2116_s15, 4  ;;  %s2016_s8 = int_to_ptr.vmem [resolvable:$false] %s2015_s8 }
  0x44   : > { %s2017_s17 = scalar_lea.vmem %s2016_s8, 16384  ;;  %p2018_p6 = scmp.lt.s32.totalorder %s2267_s12, %s2016_s8 }
  0x45   : > { %p2013_p10 = pnand %p2011_p0, %p1997_p12  ;;  %p2019_p1 = scmp.lt.s32.totalorder %s2017_s17, %s2010_s14 }
  0x47   : > { %p2014_p3 = pneg %p2013_p10  ;;  %p2020_p5 = por %p2019_p1, %p2018_p6 }
  0x49   : > { %p2021_p7 = pnand %p2020_p5, %p2014_p3 }
  0x4b   : > { %2024 = shalt.err (!%p2021_p7)
}
  0x4c   : > { %s2117_s7 = smov 768   ;;  %s2982_s24 = smov 16  }
  0x4d   : > { %s2983_s9 = smov 256   ;;  %p2984_p12 = scmp.ne.s32.totalorder %s2978_s6, 0 }
  0x4e   : > { %1781 = dma.hbm_to_vmem [thread:$0]  (!%p2981_p8), %s2262_s30, 8192, %s2267_s12, %s2269_s27, %s2117_s7, %s2983_s9, %s2982_s24  }
  0x4f   : > { %254 = sbr.rel (%p2984_p12) target bundleno = 618 (0x26a), region = 40  ;;  %p2985_p2 = scmp.ne.s32.totalorder (!%p2984_p12), %s2972_s26, 0 }
  0x56   : > { %2078 = dma.done.wait (%p2985_p2), [#allocation3], 8192  }
  0x57   : > { %2080 = vsyncadd (%p2985_p2), [#allocation3], 4294959104  ;;  %s2306_s16 = sand.u32 1, %s2095_s19   ;;  %p2986_p8 = scmp.ne.s32.totalorder %s2974_s28, 0 }
  0x58   : > { %s1660_s10 = sshll.u32 %s2306_s16, 9  ;;  %s261_s25 = scalar_lea.sflag [#allocation6], %s2306_s16 }
  0x59   : > { %s2312_s30 = scalar_lea.vmem [#allocation5], %s1660_s10 }
  0x5a   : > { %2082 = dma.done.wait (%p2986_p8), %s261_s25, 8192  }
  0x5b   : > { %2084 = vsyncadd (%p2986_p8), %s261_s25, 4294959104  ;;  %v338_v0 = vld [vmem:[#allocation2 + $0x110] sm:$0xff]  ;;  %v339_v1 = vld [vmem:[#allocation2 + $0x118] sm:$0xff]  ;;  %s1662_s12 = sshll.u32 %s2103_s21, 1  ;;  %s2774_s17 = scalar_lea.vmem [#allocation7], %s1660_s10 }
  0x5c   : > { %v2318_v2 = vld [vmem:[#allocation2] sm:$0xff]  ;;  %v421_v3 = vadd.f32 %v339_v1, %v338_v0  ;;  %v2320_v4 = vld [vmem:[#allocation2 + $0x8] sm:$0xff]  ;;  %v2338_v14 = vld [vmem:[#allocation2 + $0x10] sm:$0xff]  ;;  %v533_v17 = vmul.f32 %v338_v0, %v338_v0  ;;  %v534_v18 = vmul.f32 %v339_v1, %v339_v1  ;;  %p298_p9 = scmp.lt.s32.totalorder %s1662_s12, 5  ;;  %s1669_s7 = sshll.u32 %s2103_s21, 8 }
  0x5d   : > { %v499_v5 = vmul.f32 %v2318_v2, %v2318_v2  ;;  %v2324_v6 = vld [vmem:[#allocation2 + $0x100] sm:$0xff]  ;;  %v2326_v7 = vld [vmem:[#allocation2 + $0x108] sm:$0xff]  ;;  %v370_v8 = vadd.f32 %v2320_v4, %v2318_v2  ;;  %v500_v9 = vmul.f32 %v2320_v4, %v2320_v4  ;;  %v2340_v15 = vld [vmem:[#allocation2 + $0x18] sm:$0xff]  ;;  %v501_v20 = vmul.f32 %v2338_v14, %v2338_v14  ;;  %s1543_s24 = sshll.u32 %s2774_s17, 4  ;;  %s2900_s25 = scalar_lea.hbm %s2962_s5, %s1669_s7  ;;  %s2904_s24 = int_to_ptr.vmem [resolvable:$true] %s1543_s24 }
  0x5e   : > { %422 = vadd.xlane.f32.xlu1 %v421_v3  ;;  %v531_v10 = vmul.f32 %v2324_v6, %v2324_v6  ;;  %v532_v11 = vmul.f32 %v2326_v7, %v2326_v7  ;;  %v418_v13 = vadd.f32 %v2326_v7, %v2324_v6  ;;  %v373_v19 = vadd.f32 %v2340_v15, %v2338_v14  ;;  %v340_v24 = vld [vmem:[#allocation2 + $0x120] sm:$0xff]  ;;  %v341_v25 = vld [vmem:[#allocation2 + $0x128] sm:$0xff]  ;;  %v342_v36 = vld [vmem:[#allocation2 + $0x130] sm:$0xff]  ;;  %s2998_s12 = smov (!%p298_p9, %s1662_s12), 5  ;;  %s1527_s21 = scalar_lea.sflag [#allocation4], %s2306_s16 }
  0x5f   : > { %371 = vadd.xlane.f32.xlu0 %v370_v8  ;;  %v563_v12 = vadd.f32 %v500_v9, %v499_v5  ;;  %v502_v21 = vmul.f32 %v2340_v15, %v2340_v15  ;;  %v614_v22 = vadd.f32 %v534_v18, %v533_v17  ;;  %v308_v26 = vld [vmem:[#allocation2 + $0x20] sm:$0xff]  ;;  %v309_v27 = vld [vmem:[#allocation2 + $0x28] sm:$0xff]  ;;  %v424_v28 = vadd.f32 %v341_v25, %v340_v24  ;;  %v343_v37 = vld [vmem:[#allocation2 + $0x138] sm:$0xff]  ;;  %s300_s8 = scalar_lea.vmem %s2961_s4, %s2998_s12  ;;  %p2987_p4 = scmp.ne.s32.totalorder %s2975_s29, 0 }
  0x60   : > { %v611_v16 = vadd.f32 %v532_v11, %v531_v10  ;;  %v535_v29 = vmul.f32 %v340_v24, %v340_v24  ;;  %v536_v30 = vmul.f32 %v341_v25, %v341_v25  ;;  %v376_v31 = vadd.f32 %v309_v27, %v308_v26  ;;  %v310_v38 = vld [vmem:[#allocation2 + $0x30] sm:$0xff]  ;;  %v311_v39 = vld [vmem:[#allocation2 + $0x38] sm:$0xff]  ;;  %v1130_v46 = vld [vmem:[%s2312_s30 + $0x8] sm:$0xff]  ;;  %s2118_s26 = smov [#allocation7]  }
  0x61   : > { %v566_v23 = vadd.f32 %v502_v21, %v501_v20  ;;  %v503_v32 = vmul.f32 %v308_v26, %v308_v26  ;;  %v504_v33 = vmul.f32 %v309_v27, %v309_v27  ;;  %v427_v40 = vadd.f32 %v343_v37, %v342_v36  ;;  %v1132_v47 = vld [vmem:[%s2312_s30 + $0x18] sm:$0xff]  ;;  %v1129_v48 = vld [vmem:[%s2312_s30] sm:$0xff]  ;;  %v1131_v49 = vld [vmem:[%s2312_s30 + $0x10] sm:$0xff]  ;;  %s2029_s28 = sshll.u32 %s2118_s26, 4  ;;  %s2030_s28 = int_to_ptr.vmem [resolvable:$false] %s2029_s28 }
  0x62   : > { %564 = vadd.xlane.f32.xlu1 %v563_v12  ;;  %v617_v34 = vadd.f32 %v536_v30, %v535_v29  ;;  %v537_v41 = vmul.f32 %v342_v36, %v342_v36  ;;  %v538_v42 = vmul.f32 %v343_v37, %v343_v37  ;;  %v379_v43 = vadd.f32 %v311_v39, %v310_v38  ;;  %v344_v50 = vld [vmem:[#allocation2 + $0x140] sm:$0xff]  ;;  %v1134_v51 = vld [vmem:[%s2312_s30 + $0x28] sm:$0xff]  ;;  %v1136_v52 = vld [vmem:[%s2312_s30 + $0x38] sm:$0xff]  ;;  %s2031_s6 = scalar_lea.vmem %s2030_s28, 16384  ;;  %p2032_p10 = scmp.lt.s32.totalorder %s2904_s24, %s2030_s28 }
  0x63   : > { %419 = vadd.xlane.f32.xlu0 %v418_v13  ;;  %v569_v35 = vadd.f32 %v504_v33, %v503_v32  ;;  %v505_v44 = vmul.f32 %v310_v38, %v310_v38  ;;  %v506_v45 = vmul.f32 %v311_v39, %v311_v39  ;;  %v345_v54 = vld [vmem:[#allocation2 + $0x148] sm:$0xff]  ;;  %v1670_v55 = vpack.c.bf16 %v1132_v47, %v1130_v46  ;;  %v1133_v56 = vld [vmem:[%s2312_s30 + $0x20] sm:$0xff]  ;;  %v1135_v57 = vld [vmem:[%s2312_s30 + $0x30] sm:$0xff] }
  0x64   : > { %v620_v53 = vadd.f32 %v538_v42, %v537_v41  ;;  %v1672_v59 = vpack.c.bf16 %v1131_v49, %v1129_v48  ;;  %v1138_v60 = vld [vmem:[%s2312_s30 + $0x48] sm:$0xff]  ;;  %v1140_v61 = vld [vmem:[%s2312_s30 + $0x58] sm:$0xff]  ;;  %v312_v62 = vld [vmem:[#allocation2 + $0x40] sm:$0xff]  ;;  %v1674_v0 = vpack.c.bf16 %v1136_v52, %v1134_v51  ;;  %v430_v1 = vadd.f32 %v345_v54, %v344_v50 }
  0x65   : > { %v572_v58 = vadd.f32 %v506_v45, %v505_v44  ;;  %v313_v63 = vld [vmem:[#allocation2 + $0x48] sm:$0xff]  ;;  %1671 = vmatprep.subr.bf16.mxu0 %v1670_v55  ;;  %1734 = vmatprep.subr.bf16.mxu1 %v1670_v55  ;;  %v1676_v3 = vpack.c.bf16 %v1135_v57, %v1133_v56  ;;  %v539_v5 = vmul.f32 %v344_v50, %v344_v50  ;;  %v1137_v10 = vld [vmem:[%s2312_s30 + $0x40] sm:$0xff]  ;;  %v1139_v11 = vld [vmem:[%s2312_s30 + $0x50] sm:$0xff] }
  0x66   : > { %612 = vadd.xlane.f32.xlu1 %v611_v16  ;;  %1673 = vmatpush1.bf16.msra.mxu0 %v1672_v59  ;;  %v540_v8 = vmul.f32 %v345_v54, %v345_v54  ;;  %v1678_v9 = vpack.c.bf16 %v1140_v61, %v1138_v60  ;;  %v382_v12 = vadd.f32 %v313_v63, %v312_v62  ;;  %v1142_v17 = vld [vmem:[%s2312_s30 + $0x68] sm:$0xff]  ;;  %v1144_v18 = vld [vmem:[%s2312_s30 + $0x78] sm:$0xff]  ;;  %v1141_v24 = vld [vmem:[%s2312_s30 + $0x60] sm:$0xff] }
  0x67   : > { %374 = vadd.xlane.f32.xlu0 %v373_v19  ;;  %1750 = vmatpush1.bf16.msra.mxu1 %v1672_v59  ;;  %v507_v13 = vmul.f32 %v312_v62, %v312_v62  ;;  %v508_v16 = vmul.f32 %v313_v63, %v313_v63  ;;  %v346_v19 = vld [vmem:[#allocation2 + $0x150] sm:$0xff]  ;;  %v1680_v20 = vpack.c.bf16 %v1139_v11, %v1137_v10  ;;  %v1146_v27 = vld [vmem:[%s2312_s30 + $0x88] sm:$0xff]  ;;  %v315_v30 = vld [vmem:[#allocation2 + $0x58] sm:$0xff] }
  0x68   : > { %1675 = vmatprep.subr.bf16.mxu0 %v1674_v0  ;;  %1735 = vmatprep.subr.bf16.mxu1 %v1674_v0  ;;  %v623_v21 = vadd.f32 %v540_v8, %v539_v5  ;;  %v1143_v25 = vld [vmem:[%s2312_s30 + $0x70] sm:$0xff]  ;;  %v541_v33 = vmul.f32 %v346_v19, %v346_v19  ;;  %v1145_v36 = vld [vmem:[%s2312_s30 + $0x80] sm:$0xff]  ;;  %v1150_v41 = vld [vmem:[%s2312_s30 + $0xa8] sm:$0xff] }
  0x69   : > { %v575_v26 = vadd.f32 %v508_v16, %v507_v13  ;;  %v314_v29 = vld [vmem:[#allocation2 + $0x50] sm:$0xff]  ;;  %v1684_v32 = vpack.c.bf16 %v1143_v25, %v1141_v24  ;;  %v1152_v42 = vld [vmem:[%s2312_s30 + $0xb8] sm:$0xff]  ;;  %v349_v46 = vld [vmem:[#allocation2 + $0x168] sm:$0xff] }
  0x6a   : > { %615 = vadd.xlane.f32.xlu1 %v614_v22  ;;  %1677 = vmatpush1.bf16.msra.mxu0 %v1676_v3  ;;  %v347_v22 = vld [vmem:[#allocation2 + $0x158] sm:$0xff]  ;;  %v1147_v37 = vld [vmem:[%s2312_s30 + $0x90] sm:$0xff]  ;;  %v385_v38 = vadd.f32 %v315_v30, %v314_v29  ;;  %v509_v39 = vmul.f32 %v314_v29, %v314_v29  ;;  %v1690_v47 = vpack.c.bf16 %v1152_v42, %v1150_v41  ;;  %v1149_v48 = vld [vmem:[%s2312_s30 + $0xa0] sm:$0xff] }
  0x6b   : > { %567 = vadd.xlane.f32.xlu0 %v566_v23  ;;  %1751 = vmatpush1.bf16.msra.mxu1 %v1676_v3  ;;  %v1682_v23 = vpack.c.bf16 %v1144_v18, %v1142_v17  ;;  %v1688_v44 = vpack.c.bf16 %v1147_v37, %v1145_v36  ;;  %v1151_v49 = vld [vmem:[%s2312_s30 + $0xb0] sm:$0xff]  ;;  %v1154_v51 = vld [vmem:[%s2312_s30 + $0xc8] sm:$0xff]  ;;  %v1156_v52 = vld [vmem:[%s2312_s30 + $0xd8] sm:$0xff] }
  0x6c   : > { %1679 = vmatprep.subr.bf16.mxu0 %v1678_v9  ;;  %1736 = vmatprep.subr.bf16.mxu1 %v1678_v9  ;;  %v317_v54 = vld [vmem:[#allocation2 + $0x68] sm:$0xff]  ;;  %v1692_v56 = vpack.c.bf16 %v1151_v49, %v1149_v48  ;;  %v1694_v59 = vpack.c.bf16 %v1156_v52, %v1154_v51  ;;  %v1153_v60 = vld [vmem:[%s2312_s30 + $0xc0] sm:$0xff]  ;;  %v1155_v61 = vld [vmem:[%s2312_s30 + $0xd0] sm:$0xff] }
  0x6d   : > { %v512_v0 = vmul.f32 %v317_v54, %v317_v54  ;;  %v1160_v3 = vld [vmem:[%s2312_s30 + $0xf8] sm:$0xff]  ;;  %v350_v5 = vld [vmem:[#allocation2 + $0x170] sm:$0xff]  ;;  %v1696_v8 = vpack.c.bf16 %v1155_v61, %v1153_v60  ;;  %v1162_v17 = vld [vmem:[%s2312_s30 + $0x108] sm:$0xff] }
  0x6e   : > { %425 = vadd.xlane.f32.xlu1 %v424_v28  ;;  %v1148_v28 = vld [vmem:[%s2312_s30 + $0x98] sm:$0xff]  ;;  %1681 = vmatpush1.bf16.msra.mxu0 %v1680_v20  ;;  %v1159_v13 = vld [vmem:[%s2312_s30 + $0xf0] sm:$0xff]  ;;  %v353_v36 = vld [vmem:[#allocation2 + $0x188] sm:$0xff] }
  0x6f   : > { %377 = vadd.xlane.f32.xlu0 %v376_v31  ;;  %v433_v31 = vadd.f32 %v347_v22, %v346_v19  ;;  %1752 = vmatpush1.bf16.msra.mxu1 %v1680_v20  ;;  %v351_v10 = vld [vmem:[#allocation2 + $0x178] sm:$0xff]  ;;  %v318_v19 = vld [vmem:[#allocation2 + $0x70] sm:$0xff]  ;;  %v1170_v41 = vld [vmem:[%s2312_s30 + $0x148] sm:$0xff]  ;;  %v548_v48 = vmul.f32 %v353_v36, %v353_v36 }
  0x70   : > { %1683 = vmatprep.subr.bf16.mxu0 %v1682_v23  ;;  %1737 = vmatprep.subr.bf16.mxu1 %v1682_v23  ;;  %v1164_v18 = vld [vmem:[%s2312_s30 + $0x118] sm:$0xff]  ;;  %v545_v23 = vmul.f32 %v350_v5, %v350_v5  ;;  %v546_v24 = vmul.f32 %v351_v10, %v351_v10  ;;  %v513_v29 = vmul.f32 %v318_v19, %v318_v19  ;;  %v1171_v51 = vld [vmem:[%s2312_s30 + $0x150] sm:$0xff] }
  0x71   : > { %v319_v20 = vld [vmem:[#allocation2 + $0x78] sm:$0xff]  ;;  %v1702_v25 = vpack.c.bf16 %v1164_v18, %v1162_v17  ;;  %v1179_v17 = vld [vmem:[%s2312_s30 + $0x190] sm:$0xff] }
  0x72   : > { %618 = vadd.xlane.f32.xlu1 %v617_v34  ;;  %v542_v34 = vmul.f32 %v347_v22, %v347_v22  ;;  %1685 = vmatpush1.bf16.msra.mxu0 %v1684_v32  ;;  %v1172_v42 = vld [vmem:[%s2312_s30 + $0x158] sm:$0xff] }
  0x73   : > { %570 = vadd.xlane.f32.xlu0 %v569_v35  ;;  %v1686_v35 = vpack.c.bf16 %v1148_v28, %v1146_v27  ;;  %1753 = vmatpush1.bf16.msra.mxu1 %v1684_v32  ;;  %v1163_v27 = vld [vmem:[%s2312_s30 + $0x110] sm:$0xff]  ;;  %v391_v28 = vadd.f32 %v319_v20, %v318_v19  ;;  %v1168_v32 = vld [vmem:[%s2312_s30 + $0x138] sm:$0xff]  ;;  %v1710_v49 = vpack.c.bf16 %v1172_v42, %v1170_v41 }
  0x74   : > { %v626_v45 = vadd.f32 %v542_v34, %v541_v33  ;;  %v352_v33 = vld [vmem:[#allocation2 + $0x180] sm:$0xff]  ;;  %v355_v60 = vld [vmem:[#allocation2 + $0x198] sm:$0xff]  ;;  %v1187_v41 = vld [vmem:[%s2312_s30 + $0x1d0] sm:$0xff] }
  0x75   : > { %1687 = vmatprep.subr.bf16.mxu0 %v1686_v35  ;;  %1738 = vmatprep.subr.bf16.mxu1 %v1686_v35  ;;  %v632_v35 = vadd.f32 %v546_v24, %v545_v23  ;;  %v356_v23 = vld [vmem:[#allocation2 + $0x1a0] sm:$0xff] }
  0x76   : > { %428 = vadd.xlane.f32.xlu1 %v427_v40  ;;  %v510_v40 = vmul.f32 %v315_v30, %v315_v30  ;;  %1689 = vmatpush1.bf16.msra.mxu0 %v1688_v44  ;;  %v514_v30 = vmul.f32 %v319_v20, %v319_v20 }
  0x77   : > { %380 = vadd.xlane.f32.xlu0 %v379_v43  ;;  %v348_v43 = vld [vmem:[#allocation2 + $0x160] sm:$0xff]  ;;  %1754 = vmatpush1.bf16.msra.mxu1 %v1688_v44  ;;  %v321_v44 = vld [vmem:[#allocation2 + $0x88] sm:$0xff] }
  0x78   : > { %v578_v50 = vadd.f32 %v510_v40, %v509_v39  ;;  %v436_v55 = vadd.f32 %v349_v46, %v348_v43  ;;  %v543_v57 = vmul.f32 %v348_v43, %v348_v43  ;;  %1691 = vmatprep.subr.bf16.mxu0 %v1690_v47  ;;  %1739 = vmatprep.subr.bf16.mxu1 %v1690_v47  ;;  %v1167_v39 = vld [vmem:[%s2312_s30 + $0x130] sm:$0xff]  ;;  %v320_v43 = vld [vmem:[#allocation2 + $0x80] sm:$0xff] }
  0x79   : > { %v584_v40 = vadd.f32 %v514_v30, %v513_v29  ;;  %v547_v47 = vmul.f32 %v352_v33, %v352_v33  ;;  %v394_v52 = vadd.f32 %v321_v44, %v320_v43  ;;  %v1183_v29 = vld [vmem:[%s2312_s30 + $0x1b0] sm:$0xff] }
  0x7a   : > { %621 = vadd.xlane.f32.xlu1 %v620_v53  ;;  %v316_v53 = vld [vmem:[#allocation2 + $0x60] sm:$0xff]  ;;  %1693 = vmatpush1.bf16.msra.mxu0 %v1692_v56 }
  0x7b   : > { %573 = vadd.xlane.f32.xlu0 %v572_v58  ;;  %v544_v58 = vmul.f32 %v349_v46, %v349_v46  ;;  %v388_v62 = vadd.f32 %v317_v54, %v316_v53  ;;  %v511_v63 = vmul.f32 %v316_v53, %v316_v53  ;;  %1755 = vmatpush1.bf16.msra.mxu1 %v1692_v56  ;;  %v1176_v56 = vld [vmem:[%s2312_s30 + $0x178] sm:$0xff] }
  0x7c   : > { %1695 = vmatprep.subr.bf16.mxu0 %v1694_v59  ;;  %1740 = vmatprep.subr.bf16.mxu1 %v1694_v59  ;;  %v515_v53 = vmul.f32 %v320_v43, %v320_v43  ;;  %v516_v54 = vmul.f32 %v321_v44, %v321_v44  ;;  %v635_v59 = vadd.f32 %v548_v48, %v547_v47 }
  0x7d   : > { %v629_v9 = vadd.f32 %v544_v58, %v543_v57  ;;  %v581_v16 = vadd.f32 %v512_v0, %v511_v63  ;;  %v354_v57 = vld [vmem:[#allocation2 + $0x190] sm:$0xff] }
  0x7e   : > { %431 = vadd.xlane.f32.xlu1 %v430_v1  ;;  %v1158_v1 = vld [vmem:[%s2312_s30 + $0xe8] sm:$0xff]  ;;  %1697 = vmatpush1.bf16.msra.mxu0 %v1696_v8  ;;  %v1175_v63 = vld [vmem:[%s2312_s30 + $0x170] sm:$0xff]  ;;  %v587_v0 = vadd.f32 %v516_v54, %v515_v53  ;;  %v359_v54 = vld [vmem:[#allocation2 + $0x1b8] sm:$0xff] }
  0x7f   : > { %383 = vadd.xlane.f32.xlu0 %v382_v12  ;;  %v1698_v11 = vpack.c.bf16 %v1160_v3, %v1158_v1  ;;  %v1157_v12 = vld [vmem:[%s2312_s30 + $0xe0] sm:$0xff]  ;;  %1756 = vmatpush1.bf16.msra.mxu1 %v1696_v8  ;;  %v1178_v1 = vld [vmem:[%s2312_s30 + $0x188] sm:$0xff]  ;;  %v1180_v3 = vld [vmem:[%s2312_s30 + $0x198] sm:$0xff] }
  0x80   : > { %v1700_v22 = vpack.c.bf16 %v1159_v13, %v1157_v12  ;;  %v323_v8 = vld [vmem:[#allocation2 + $0x98] sm:$0xff]  ;;  %v550_v12 = vmul.f32 %v355_v60, %v355_v60  ;;  %v1718_v13 = vpack.c.bf16 %v1180_v3, %v1178_v1  ;;  %v358_v53 = vld [vmem:[#allocation2 + $0x1b0] sm:$0xff]  ;;  %v360_v3 = vld [vmem:[#allocation2 + $0x1c0] sm:$0xff] }
  0x81   : > { %1699 = vmatprep.subr.bf16.mxu0 %v1698_v11  ;;  %1741 = vmatprep.subr.bf16.mxu1 %v1698_v11  ;;  %v549_v11 = vmul.f32 %v354_v57, %v354_v57  ;;  %v518_v20 = vmul.f32 %v323_v8, %v323_v8 }
  0x82   : > { %624 = vadd.xlane.f32.xlu1 %v623_v21  ;;  %v439_v21 = vadd.f32 %v351_v10, %v350_v5  ;;  %1701 = vmatpush1.bf16.msra.mxu0 %v1700_v22  ;;  %v322_v5 = vld [vmem:[#allocation2 + $0x90] sm:$0xff] }
  0x83   : > { %576 = vadd.xlane.f32.xlu0 %v575_v26  ;;  %v1161_v26 = vld [vmem:[%s2312_s30 + $0x100] sm:$0xff]  ;;  %1757 = vmatpush1.bf16.msra.mxu1 %v1700_v22  ;;  %v397_v18 = vadd.f32 %v323_v8, %v322_v5  ;;  %v517_v19 = vmul.f32 %v322_v5, %v322_v5  ;;  %v1184_v22 = vld [vmem:[%s2312_s30 + $0x1b8] sm:$0xff]  ;;  %v361_v5 = vld [vmem:[#allocation2 + $0x1c8] sm:$0xff] }
  0x84   : > { %v1704_v34 = vpack.c.bf16 %v1163_v27, %v1161_v26  ;;  %1703 = vmatprep.subr.bf16.mxu0 %v1702_v25  ;;  %1742 = vmatprep.subr.bf16.mxu1 %v1702_v25  ;;  %v638_v25 = vadd.f32 %v550_v12, %v549_v11  ;;  %v357_v26 = vld [vmem:[#allocation2 + $0x1a8] sm:$0xff]  ;;  %v328_v8 = vld [vmem:[#allocation2 + $0xc0] sm:$0xff]  ;;  %v555_v11 = vmul.f32 %v360_v3, %v360_v3 }
  0x85   : > { %v590_v30 = vadd.f32 %v518_v20, %v517_v19  ;;  %v556_v12 = vmul.f32 %v361_v5, %v361_v5  ;;  %v362_v20 = vld [vmem:[#allocation2 + $0x1d0] sm:$0xff] }
  0x86   : > { %434 = vadd.xlane.f32.xlu1 %v433_v31  ;;  %v1166_v31 = vld [vmem:[%s2312_s30 + $0x128] sm:$0xff]  ;;  %1705 = vmatpush1.bf16.msra.mxu0 %v1704_v34 }
  0x87   : > { %386 = vadd.xlane.f32.xlu0 %v385_v38  ;;  %v1706_v37 = vpack.c.bf16 %v1168_v32, %v1166_v31  ;;  %v1165_v38 = vld [vmem:[%s2312_s30 + $0x120] sm:$0xff]  ;;  %1758 = vmatpush1.bf16.msra.mxu1 %v1704_v34  ;;  %v1186_v31 = vld [vmem:[%s2312_s30 + $0x1c8] sm:$0xff]  ;;  %v1188_v32 = vld [vmem:[%s2312_s30 + $0x1d8] sm:$0xff] }
  0x88   : > { %v1708_v46 = vpack.c.bf16 %v1167_v39, %v1165_v38  ;;  %v325_v34 = vld [vmem:[#allocation2 + $0xa8] sm:$0xff]  ;;  %v552_v38 = vmul.f32 %v357_v26, %v357_v26  ;;  %v1726_v39 = vpack.c.bf16 %v1188_v32, %v1186_v31  ;;  %v364_v32 = vld [vmem:[#allocation2 + $0x1e0] sm:$0xff] }
  0x89   : > { %1707 = vmatprep.subr.bf16.mxu0 %v1706_v37  ;;  %1743 = vmatprep.subr.bf16.mxu1 %v1706_v37  ;;  %v551_v37 = vmul.f32 %v356_v23, %v356_v23  ;;  %v520_v44 = vmul.f32 %v325_v34, %v325_v34 }
  0x8a   : > { %627 = vadd.xlane.f32.xlu1 %v626_v45  ;;  %v442_v45 = vadd.f32 %v353_v36, %v352_v33  ;;  %1709 = vmatpush1.bf16.msra.mxu0 %v1708_v46  ;;  %v324_v33 = vld [vmem:[#allocation2 + $0xa0] sm:$0xff] }
  0x8b   : > { %579 = vadd.xlane.f32.xlu0 %v578_v50  ;;  %v1169_v50 = vld [vmem:[%s2312_s30 + $0x140] sm:$0xff]  ;;  %1759 = vmatpush1.bf16.msra.mxu1 %v1708_v46  ;;  %v400_v42 = vadd.f32 %v325_v34, %v324_v33  ;;  %v519_v43 = vmul.f32 %v324_v33, %v324_v33  ;;  %v1192_v46 = vld [vmem:[%s2312_s30 + $0x1f8] sm:$0xff]  ;;  %v641_v48 = vadd.f32 %v552_v38, %v551_v37  ;;  %v365_v33 = vld [vmem:[#allocation2 + $0x1e8] sm:$0xff] }
  0x8c   : > { %v1712_v58 = vpack.c.bf16 %v1171_v51, %v1169_v50  ;;  %1711 = vmatprep.subr.bf16.mxu0 %v1710_v49  ;;  %1744 = vmatprep.subr.bf16.mxu1 %v1710_v49  ;;  %v1189_v50 = vld [vmem:[%s2312_s30 + $0x1e0] sm:$0xff]  ;;  %v1191_v51 = vld [vmem:[%s2312_s30 + $0x1f0] sm:$0xff]  ;;  %v559_v37 = vmul.f32 %v364_v32, %v364_v32  ;;  %v560_v38 = vmul.f32 %v365_v33, %v365_v33 }
  0x8d   : > { %v332_v34 = vld [vmem:[#allocation2 + $0xe0] sm:$0xff] }
  0x8e   : > { %437 = vadd.xlane.f32.xlu1 %v436_v55  ;;  %v1174_v55 = vld [vmem:[%s2312_s30 + $0x168] sm:$0xff]  ;;  %1713 = vmatpush1.bf16.msra.mxu0 %v1712_v58 }
  0x8f   : > { %389 = vadd.xlane.f32.xlu0 %v388_v62  ;;  %v1714_v61 = vpack.c.bf16 %v1176_v56, %v1174_v55  ;;  %v1173_v62 = vld [vmem:[%s2312_s30 + $0x160] sm:$0xff]  ;;  %1760 = vmatpush1.bf16.msra.mxu1 %v1712_v58  ;;  %v326_v55 = vld [vmem:[#allocation2 + $0xb0] sm:$0xff]  ;;  %v327_v56 = vld [vmem:[#allocation2 + $0xb8] sm:$0xff]  ;;  %v451_v58 = vadd.f32 %v359_v54, %v358_v53 }
  0x90   : > { %v1716_v10 = vpack.c.bf16 %v1175_v63, %v1173_v62  ;;  %v521_v62 = vmul.f32 %v326_v55, %v326_v55  ;;  %v522_v63 = vmul.f32 %v327_v56, %v327_v56 }
  0x91   : > { %1715 = vmatprep.subr.bf16.mxu0 %v1714_v61  ;;  %1745 = vmatprep.subr.bf16.mxu1 %v1714_v61  ;;  %v403_v61 = vadd.f32 %v327_v56, %v326_v55 }
  0x92   : > { %630 = vadd.xlane.f32.xlu1 %v629_v9  ;;  %v445_v9 = vadd.f32 %v355_v60, %v354_v57  ;;  %1717 = vmatpush1.bf16.msra.mxu0 %v1716_v10  ;;  %v1732_v57 = vpack.c.bf16 %v1191_v51, %v1189_v50  ;;  %v554_v60 = vmul.f32 %v359_v54, %v359_v54 }
  0x93   : > { %582 = vadd.xlane.f32.xlu0 %v581_v16  ;;  %v1177_v16 = vld [vmem:[%s2312_s30 + $0x180] sm:$0xff]  ;;  %1761 = vmatpush1.bf16.msra.mxu1 %v1716_v10  ;;  %v596_v1 = vadd.f32 %v522_v63, %v521_v62  ;;  %v454_v10 = vadd.f32 %v361_v5, %v360_v3  ;;  %v916_v3 = vlaneseq }
  0x94   : > { %v1720_v24 = vpack.c.bf16 %v1179_v17, %v1177_v16  ;;  %1719 = vmatprep.subr.bf16.mxu0 %v1718_v13  ;;  %1746 = vmatprep.subr.bf16.mxu1 %v1718_v13  ;;  %v523_v16 = vmul.f32 %v328_v8, %v328_v8 }
  0x96   : > { %440 = vadd.xlane.f32.xlu1 %v439_v21  ;;  %v1182_v21 = vld [vmem:[%s2312_s30 + $0x1a8] sm:$0xff]  ;;  %1721 = vmatpush1.bf16.msra.mxu0 %v1720_v24 }
  0x97   : > { %392 = vadd.xlane.f32.xlu0 %v391_v28  ;;  %v1722_v27 = vpack.c.bf16 %v1184_v22, %v1182_v21  ;;  %v1181_v28 = vld [vmem:[%s2312_s30 + $0x1a0] sm:$0xff]  ;;  %1762 = vmatpush1.bf16.msra.mxu1 %v1720_v24  ;;  %v363_v21 = vld [vmem:[#allocation2 + $0x1d8] sm:$0xff]  ;;  %v330_v22 = vld [vmem:[#allocation2 + $0xd0] sm:$0xff] }
  0x98   : > { %v1724_v36 = vpack.c.bf16 %v1183_v29, %v1181_v28  ;;  %v457_v24 = vadd.f32 %v363_v21, %v362_v20  ;;  %v525_v28 = vmul.f32 %v330_v22, %v330_v22 }
  0x99   : > { %1723 = vmatprep.subr.bf16.mxu0 %v1722_v27  ;;  %1747 = vmatprep.subr.bf16.mxu1 %v1722_v27 }
  0x9a   : > { %633 = vadd.xlane.f32.xlu1 %v632_v35  ;;  %v448_v35 = vadd.f32 %v357_v26, %v356_v23  ;;  %1725 = vmatpush1.bf16.msra.mxu0 %v1724_v36  ;;  %v331_v23 = vld [vmem:[#allocation2 + $0xd8] sm:$0xff]  ;;  %v558_v26 = vmul.f32 %v363_v21, %v363_v21 }
  0x9b   : > { %585 = vadd.xlane.f32.xlu0 %v584_v40  ;;  %v1185_v40 = vld [vmem:[%s2312_s30 + $0x1c0] sm:$0xff]  ;;  %1763 = vmatpush1.bf16.msra.mxu1 %v1724_v36  ;;  %v409_v27 = vadd.f32 %v331_v23, %v330_v22  ;;  %v526_v29 = vmul.f32 %v331_v23, %v331_v23  ;;  %v460_v36 = vadd.f32 %v365_v33, %v364_v32 }
  0x9c   : > { %v1728_v47 = vpack.c.bf16 %v1187_v41, %v1185_v40  ;;  %1727 = vmatprep.subr.bf16.mxu0 %v1726_v39  ;;  %1748 = vmatprep.subr.bf16.mxu1 %v1726_v39  ;;  %v527_v40 = vmul.f32 %v332_v34, %v332_v34 }
  0x9d   : > { %v602_v31 = vadd.f32 %v526_v29, %v525_v28 }
  0x9e   : > { %443 = vadd.xlane.f32.xlu1 %v442_v45  ;;  %v1190_v45 = vld [vmem:[%s2312_s30 + $0x1e8] sm:$0xff]  ;;  %1729 = vmatpush1.bf16.msra.mxu0 %v1728_v47  ;;  %s2025_s30 = scalar_lea.vmem %s2904_s24, 8192 }
  0x9f   : > { %395 = vadd.xlane.f32.xlu0 %v394_v52  ;;  %v1730_v49 = vpack.c.bf16 %v1192_v46, %v1190_v45  ;;  %v593_v52 = vadd.f32 %v520_v44, %v519_v43  ;;  %1764 = vmatpush1.bf16.msra.mxu1 %v1728_v47  ;;  %v366_v44 = vld [vmem:[#allocation2 + $0x1f0] sm:$0xff]  ;;  %v367_v45 = vld [vmem:[#allocation2 + $0x1f8] sm:$0xff]  ;;  %p2026_p11 = scmp.ne.s32.totalorder %s2904_s24, %s2025_s30  ;;  %p2033_p3 = scmp.lt.s32.totalorder %s2031_s6, %s2025_s30 }
  0xa0   : > { %v334_v46 = vld [vmem:[#allocation2 + $0xf0] sm:$0xff]  ;;  %v335_v47 = vld [vmem:[#allocation2 + $0xf8] sm:$0xff]  ;;  %v562_v50 = vmul.f32 %v367_v45, %v367_v45 }
  0xa1   : > { %1731 = vmatprep.subr.bf16.mxu0 %v1730_v49  ;;  %1749 = vmatprep.subr.bf16.mxu1 %v1730_v49  ;;  %v561_v49 = vmul.f32 %v366_v44, %v366_v44  ;;  %v415_v51 = vadd.f32 %v335_v47, %v334_v46  ;;  %p2027_p13 = pnand %p2026_p11, %p2987_p4  ;;  %p2034_p6 = por %p2033_p3, %p2032_p10 }
  0xa2   : > { %636 = vadd.xlane.f32.xlu1 %v635_v59  ;;  %v553_v59 = vmul.f32 %v358_v53, %v358_v53  ;;  %1733 = vmatpush1.bf16.msra.mxu0 %v1732_v57  ;;  %v530_v53 = vmul.f32 %v335_v47, %v335_v47  ;;  %v369_v47 = vld [vmem:[%s2959_s2] sm:$0x3] }
  0xa3   : > { %588 = vadd.xlane.f32.xlu0 %v587_v0  ;;  %1765 = vmatpush1.bf16.msra.mxu1 %v1732_v57  ;;  %v656_v54 = vadd.f32 %v562_v50, %v561_v49  ;;  %p2028_p0 = pneg %p2027_p13 }
  0xa4   : > { %v644_v0 = vadd.f32 %v554_v60, %v553_v59 }
  0xa5   : > { %p2035_p1 = pnand %p2034_p6, %p2028_p0 }
  0xa6   : > { %446 = vadd.xlane.f32.xlu1 %v445_v9  ;;  %v329_v9 = vld [vmem:[#allocation2 + $0xc8] sm:$0xff] }
  0xa7   : > { %398 = vadd.xlane.f32.xlu0 %v397_v18  ;;  %v406_v13 = vadd.f32 %v329_v9, %v328_v8  ;;  %v524_v17 = vmul.f32 %v329_v9, %v329_v9  ;;  %v647_v18 = vadd.f32 %v556_v12, %v555_v11 }
  0xa9   : > { %v599_v19 = vadd.f32 %v524_v17, %v523_v16 }
  0xaa   : > { %639 = vadd.xlane.f32.xlu1 %v638_v25  ;;  %v557_v25 = vmul.f32 %v362_v20, %v362_v20 }
  0xab   : > { %591 = vadd.xlane.f32.xlu0 %v590_v30 }
  0xac   : > { %v650_v30 = vadd.f32 %v558_v26, %v557_v25 }
  0xae   : > { %449 = vadd.xlane.f32.xlu1 %v448_v35  ;;  %v333_v35 = vld [vmem:[#allocation2 + $0xe8] sm:$0xff] }
  0xaf   : > { %401 = vadd.xlane.f32.xlu0 %v400_v42  ;;  %v412_v39 = vadd.f32 %v333_v35, %v332_v34  ;;  %v528_v41 = vmul.f32 %v333_v35, %v333_v35  ;;  %v653_v42 = vadd.f32 %v560_v38, %v559_v37  ;;  %v368_v34 = vld [vmem:[%s2958_s1] sm:$0x3] }
  0xb1   : > { %v605_v43 = vadd.f32 %v528_v41, %v527_v40 }
  0xb2   : > { %642 = vadd.xlane.f32.xlu1 %v641_v48  ;;  %v463_v48 = vadd.f32 %v367_v45, %v366_v44 }
  0xb3   : > { %594 = vadd.xlane.f32.xlu0 %v593_v52  ;;  %v529_v52 = vmul.f32 %v334_v46, %v334_v46 }
  0xb5   : > { %v608_v55 = vadd.f32 %v530_v53, %v529_v52 }
  0xb6   : > { %452 = vadd.xlane.f32.xlu1 %v451_v58 }
  0xb7   : > { %404 = vadd.xlane.f32.xlu0 %v403_v61 }
  0xba   : > { %645 = vadd.xlane.f32.xlu1 %v644_v0 }
  0xbb   : > { %597 = vadd.xlane.f32.xlu0 %v596_v1 }
  0xbe   : > { %455 = vadd.xlane.f32.xlu1 %v454_v10 }
  0xbf   : > { %407 = vadd.xlane.f32.xlu0 %v406_v13 }
  0xc2   : > { %648 = vadd.xlane.f32.xlu1 %v647_v18  ;;  %v917_v18 = vshrl.u32 %v916_v3, 7 }
  0xc3   : > { %600 = vadd.xlane.f32.xlu0 %v599_v19 }
  0xc4   : > { %v2428_v29 = vsub.s32 0, %v917_v18 }
  0xc6   : > { %458 = vadd.xlane.f32.xlu1 %v457_v24  ;;  %v2440_v40 = vrot.slane %v368_v34, %v2428_v29 }
  0xc7   : > { %410 = vadd.xlane.f32.xlu0 %v409_v27 }
  0xca   : > { %651 = vadd.xlane.f32.xlu1 %v650_v30  ;;  %v2430_v30 = vsub.s32 1, %v917_v18 }
  0xcb   : > { %603 = vadd.xlane.f32.xlu0 %v602_v31 }
  0xcc   : > { %v2443_v41 = vrot.slane %v368_v34, %v2430_v30 }
  0xce   : > { %461 = vadd.xlane.f32.xlu1 %v460_v36 }
  0xcf   : > { %413 = vadd.xlane.f32.xlu0 %v412_v39 }
  0xd2   : > { %654 = vadd.xlane.f32.xlu1 %v653_v42 }
  0xd3   : > { %606 = vadd.xlane.f32.xlu0 %v605_v43 }
  0xd6   : > { %464 = vadd.xlane.f32.xlu1 %v463_v48 }
  0xd7   : > { %416 = vadd.xlane.f32.xlu0 %v415_v51 }
  0xda   : > { %657 = vadd.xlane.f32.xlu1 %v656_v54 }
  0xdb   : > { %609 = vadd.xlane.f32.xlu0 %v608_v55 }
  0xeb   : > { %v423_v56 = vpop.xlane.xlu1 %422 }
  0xec   : > { %v372_v57 = vpop.xlane.xlu0 %371  ;;  %v2418_v5 = vmul.f32 0.00390625, %v423_v56 }
  0xed   : > { %v2412_v58 = vmul.f32 0.00390625, %v372_v57 }
  0xee   : > { %v708_v20 = vmul.f32 %v2418_v5, %v2418_v5 }
  0xef   : > { %v565_v59 = vpop.xlane.xlu1 %564  ;;  %v691_v61 = vmul.f32 %v2412_v58, %v2412_v58  ;;  %v851_v49 = vsub.f32 %v2318_v2, %v2412_v58  ;;  %v852_v53 = vsub.f32 %v2320_v4, %v2412_v58 }
  0xf0   : > { %v659_v60 = vmul.f32 0.00390625, %v565_v59  ;;  %v420_v62 = vpop.xlane.xlu0 %419 }
  0xf1   : > { %v2416_v63 = vmul.f32 0.00390625, %v420_v62 }
  0xf2   : > { %v723_v0 = vsub.f32 %v659_v60, %v691_v61  ;;  %v2461_v60 = vrot.slane %v369_v47, %v2428_v29  ;;  %v2464_v61 = vrot.slane %v369_v47, %v2430_v30 }
  0xf3   : > { %v613_v1 = vpop.xlane.xlu1 %612  ;;  %v707_v10 = vmul.f32 %v2416_v63, %v2416_v63  ;;  %v883_v58 = vsub.f32 %v2324_v6, %v2416_v63 }
  0xf4   : > { %v755_v8 = vmax.f32 %v723_v0, 0.0  ;;  %v675_v9 = vmul.f32 0.00390625, %v613_v1  ;;  %v375_v11 = vpop.xlane.xlu0 %374 }
  0xf5   : > { %v2422_v12 = vmul.f32 0.00390625, %v375_v11 }
  0xf6   : > { %v787_v13 = vadd.f32 1e-05, %v755_v8  ;;  %v739_v16 = vsub.f32 %v675_v9, %v707_v10 }
  0xf7   : > { %v616_v17 = vpop.xlane.xlu1 %615  ;;  %v692_v23 = vmul.f32 %v2422_v12, %v2422_v12  ;;  %v854_v47 = vsub.f32 %v2340_v15, %v2422_v12 }
  0xf8   : > { %1845 = vrsqrt.f32 %v787_v13  ;;  %v771_v19 = vmax.f32 %v739_v16, 0.0  ;;  %v676_v21 = vmul.f32 0.00390625, %v616_v17  ;;  %v568_v22 = vpop.xlane.xlu0 %567  ;;  %v884_v13 = vsub.f32 %v2326_v7, %v2416_v63 }
  0xf9   : > { %v660_v24 = vmul.f32 0.00390625, %v568_v22 }
  0xfa   : > { %v803_v25 = vadd.f32 1e-05, %v771_v19  ;;  %v740_v26 = vsub.f32 %v676_v21, %v708_v20 }
  0xfb   : > { %v724_v27 = vsub.f32 %v660_v24, %v692_v23  ;;  %v426_v28 = vpop.xlane.xlu1 %425 }
  0xfc   : > { %1847 = vrsqrt.f32 %v803_v25  ;;  %v772_v31 = vmax.f32 %v740_v26, 0.0  ;;  %v2432_v32 = vmul.f32 0.00390625, %v426_v28  ;;  %v378_v33 = vpop.xlane.xlu0 %377 }
  0xfd   : > { %v756_v35 = vmax.f32 %v724_v27, 0.0  ;;  %v2437_v36 = vmul.f32 0.00390625, %v378_v33 }
  0xfe   : > { %v804_v37 = vadd.f32 1e-05, %v772_v31  ;;  %v709_v42 = vmul.f32 %v2432_v32, %v2432_v32 }
  0xff   : > { %v788_v38 = vadd.f32 1e-05, %v756_v35  ;;  %v619_v39 = vpop.xlane.xlu1 %618  ;;  %v693_v45 = vmul.f32 %v2437_v36, %v2437_v36 }
 0x100   : > { %1849 = vrsqrt.f32 %v804_v37  ;;  %v677_v43 = vmul.f32 0.00390625, %v619_v39  ;;  %v571_v44 = vpop.xlane.xlu0 %570 }
 0x101   : > { %1851 = vrsqrt.f32 %v788_v38  ;;  %v661_v46 = vmul.f32 0.00390625, %v571_v44 }
 0x102   : > { %v1846_v48 = vpop.eup %1845  ;;  %v741_v50 = vsub.f32 %v677_v43, %v709_v42  ;;  %v1909_v43 = vld [vmem:[#allocation2 + $0x110] sm:$0xff] }
 0x103   : > { %v725_v51 = vsub.f32 %v661_v46, %v693_v45  ;;  %v429_v52 = vpop.xlane.xlu1 %428  ;;  %v927_v54 = vmul.f32 %v1846_v48, %v2443_v41  ;;  %v926_v55 = vmul.f32 %v1846_v48, %v2440_v40  ;;  %v885_v44 = vsub.f32 %v1909_v43, %v2418_v5  ;;  %v1910_v45 = vld [vmem:[#allocation2 + $0x118] sm:$0xff] }
 0x104   : > { %v773_v56 = vmax.f32 %v741_v50, 0.0  ;;  %v2458_v57 = vmul.f32 0.00390625, %v429_v52  ;;  %v381_v59 = vpop.xlane.xlu0 %380  ;;  %v886_v46 = vsub.f32 %v1910_v45, %v2418_v5 }
 0x105   : > { %v757_v2 = vmax.f32 %v725_v51, 0.0  ;;  %v2466_v62 = vmul.f32 0.00390625, %v381_v59  ;;  %v991_v0 = vmul.f32 %v927_v54, %v852_v53  ;;  %v990_v1 = vmul.f32 %v926_v55, %v851_v49 }
 0x106   : > { %v1848_v4 = vpop.eup %1847  ;;  %v805_v3 = vadd.f32 1e-05, %v773_v56  ;;  %v710_v9 = vmul.f32 %v2458_v57, %v2458_v57  ;;  %v853_v49 = vsub.f32 %v2338_v14, %v2422_v12 }
 0x107   : > { %v789_v8 = vadd.f32 1e-05, %v757_v2  ;;  %v622_v10 = vpop.xlane.xlu1 %621  ;;  %v694_v11 = vmul.f32 %v2466_v62, %v2466_v62  ;;  %v1066_v18 = vadd.f32 %v2464_v61, %v991_v0  ;;  %v1065_v19 = vadd.f32 %v2461_v60, %v990_v1  ;;  %v1911_v2 = vld [vmem:[#allocation2 + $0x128] sm:$0xff] }
 0x108   : > { %1853 = vrsqrt.f32 %v805_v3  ;;  %v678_v16 = vmul.f32 0.00390625, %v622_v10  ;;  %v574_v17 = vpop.xlane.xlu0 %573  ;;  %v959_v20 = vmul.f32 %v1848_v4, %v2443_v41  ;;  %v958_v21 = vmul.f32 %v1848_v4, %v2440_v40 }
 0x109   : > { %1855 = vrsqrt.f32 %v789_v8  ;;  %v662_v6 = vmul.f32 0.00390625, %v574_v17  ;;  %1269 = vmatprep.mubr.f32.mxu0 %v1066_v18  ;;  %v888_v0 = vsub.f32 %v1911_v2, %v2432_v32 }
 0x10a   : > { %v1850_v22 = vpop.eup %1849  ;;  %v742_v23 = vsub.f32 %v678_v16, %v710_v9  ;;  %1270 = vmatmul.mubr.f32.vlgmr.msra.gmra.mrb[0].mxu0 %v1065_v19  ;;  %v1023_v63 = vmul.f32 %v959_v20, %v884_v13  ;;  %v1022_v26 = vmul.f32 %v958_v21, %v883_v58 }
 0x10b   : > { %v1852_v24 = vpop.eup %1851  ;;  %v726_v25 = vsub.f32 %v662_v6, %v694_v11  ;;  %v432_v7 = vpop.xlane.xlu1 %431  ;;  %v961_v27 = vmul.f32 %v1850_v22, %v2443_v41  ;;  %v960_v14 = vmul.f32 %v1850_v22, %v2440_v40 }
 0x10c   : > { %v774_v28 = vmax.f32 %v742_v23, 0.0  ;;  %v2481_v31 = vmul.f32 0.00390625, %v432_v7  ;;  %v384_v33 = vpop.xlane.xlu0 %383  ;;  %v929_v34 = vmul.f32 %v1852_v24, %v2443_v41  ;;  %v928_v35 = vmul.f32 %v1852_v24, %v2440_v40  ;;  %v1912_v24 = vld [vmem:[#allocation2 + $0x120] sm:$0xff]  ;;  %v1913_v7 = vld [vmem:[#allocation2 + $0x28] sm:$0xff] }
 0x10d   : > { %v758_v37 = vmax.f32 %v726_v25, 0.0  ;;  %v2485_v38 = vmul.f32 0.00390625, %v384_v33  ;;  %v1098_v39 = vadd.f32 %v2464_v61, %v1023_v63  ;;  %v1097_v42 = vadd.f32 %v2461_v60, %v1022_v26 }
 0x10e   : > { %v806_v48 = vadd.f32 1e-05, %v774_v28  ;;  %v711_v51 = vmul.f32 %v2481_v31, %v2481_v31  ;;  %v993_v55 = vmul.f32 %v929_v34, %v854_v47  ;;  %v1025_v56 = vmul.f32 %v961_v27, %v886_v46  ;;  %v1914_v27 = vld [vmem:[#allocation2 + $0x20] sm:$0xff]  ;;  %v1915_v47 = vld [vmem:[#allocation2 + $0x138] sm:$0xff] }
 0x10f   : > { %v790_v50 = vadd.f32 1e-05, %v758_v37  ;;  %1365 = vmatprep.mubr.f32.mxu1 %v1098_v39  ;;  %v625_v52 = vpop.xlane.xlu1 %624  ;;  %v695_v53 = vmul.f32 %v2485_v38, %v2485_v38  ;;  %v992_v59 = vmul.f32 %v928_v35, %v853_v49  ;;  %v1024_v10 = vmul.f32 %v960_v14, %v885_v44 }
 0x110   : > { %1857 = vrsqrt.f32 %v806_v48  ;;  %1366 = vmatmul.mubr.f32.vlgmr.msra.gmra.mrb[0].mxu1 %v1097_v42  ;;  %v679_v54 = vmul.f32 0.00390625, %v625_v52  ;;  %v577_v5 = vpop.xlane.xlu0 %576  ;;  %v1068_v4 = vadd.f32 %v2464_v61, %v993_v55  ;;  %v1100_v58 = vadd.f32 %v2464_v61, %v1025_v56 }
 0x111   : > { %1859 = vrsqrt.f32 %v790_v50  ;;  %v663_v15 = vmul.f32 0.00390625, %v577_v5  ;;  %v1067_v9 = vadd.f32 %v2461_v60, %v992_v59  ;;  %v1099_v21 = vadd.f32 %v2461_v60, %v1024_v10 }
 0x112   : > { %v1854_v12 = vpop.eup %1853  ;;  %v743_v1 = vsub.f32 %v679_v54, %v711_v51  ;;  %1275 = vmatprep.mubr.f32.mxu0 %v1068_v4  ;;  %1371 = vmatprep.mubr.f32.mxu1 %v1100_v58  ;;  %v887_v25 = vsub.f32 %v1912_v24, %v2432_v32  ;;  %v856_v63 = vsub.f32 %v1913_v7, %v2437_v36  ;;  %v1916_v58 = vld [vmem:[#allocation2 + $0x130] sm:$0xff] }
 0x113   : > { %v1856_v3 = vpop.eup %1855  ;;  %v727_v8 = vsub.f32 %v663_v15, %v695_v53  ;;  %v435_v11 = vpop.xlane.xlu1 %434  ;;  %v963_v13 = vmul.f32 %v1854_v12, %v2443_v41  ;;  %1276 = vmatmul.mubr.f32.gmra.mrb[2].mxu0 %v1067_v9  ;;  %v855_v28 = vsub.f32 %v1914_v27, %v2437_v36  ;;  %v962_v36 = vmul.f32 %v1854_v12, %v2440_v40 }
 0x114   : > { %v775_v16 = vmax.f32 %v743_v1, 0.0  ;;  %v2505_v17 = vmul.f32 0.00390625, %v435_v11  ;;  %v387_v18 = vpop.xlane.xlu0 %386  ;;  %v931_v19 = vmul.f32 %v1856_v3, %v2443_v41  ;;  %v930_v6 = vmul.f32 %v1856_v3, %v2440_v40  ;;  %1372 = vmatmul.mubr.f32.gmra.mrb[2].mxu1 %v1099_v21  ;;  %v1918_v11 = vld [vmem:[#allocation2 + $0x30] sm:$0xff] }
 0x115   : > { %v759_v20 = vmax.f32 %v727_v8, 0.0  ;;  %v2510_v22 = vmul.f32 0.00390625, %v387_v18  ;;  %v1027_v23 = vmul.f32 %v963_v13, %v888_v0  ;;  %v890_v48 = vsub.f32 %v1915_v47, %v2458_v57  ;;  %v1917_v8 = vld [vmem:[#allocation2 + $0x38] sm:$0xff] }
 0x116   : > { %v807_v26 = vadd.f32 1e-05, %v775_v16  ;;  %v712_v34 = vmul.f32 %v2505_v17, %v2505_v17  ;;  %v995_v32 = vmul.f32 %v931_v19, %v856_v63  ;;  %v994_v45 = vmul.f32 %v930_v6, %v855_v28  ;;  %v1919_v63 = vld [vmem:[#allocation2 + $0x148] sm:$0xff] }
 0x117   : > { %v791_v33 = vadd.f32 1e-05, %v759_v20  ;;  %v628_v35 = vpop.xlane.xlu1 %627  ;;  %v696_v37 = vmul.f32 %v2510_v22, %v2510_v22  ;;  %v1102_v43 = vadd.f32 %v2464_v61, %v1027_v23  ;;  %v1026_v54 = vmul.f32 %v962_v36, %v887_v25 }
 0x118   : > { %1861 = vrsqrt.f32 %v807_v26  ;;  %v680_v39 = vmul.f32 0.00390625, %v628_v35  ;;  %v580_v42 = vpop.xlane.xlu0 %579  ;;  %v1070_v50 = vadd.f32 %v2464_v61, %v995_v32  ;;  %v1069_v53 = vadd.f32 %v2461_v60, %v994_v45 }
 0x119   : > { %1863 = vrsqrt.f32 %v791_v33  ;;  %v664_v44 = vmul.f32 0.00390625, %v580_v42  ;;  %1377 = vmatprep.mubr.f32.mxu1 %v1102_v43  ;;  %v1101_v0 = vadd.f32 %v2461_v60, %v1026_v54  ;;  %v889_v3 = vsub.f32 %v1916_v58, %v2458_v57 }
 0x11a   : > { %v1858_v46 = vpop.eup %1857  ;;  %v744_v49 = vsub.f32 %v680_v39, %v712_v34  ;;  %1281 = vmatprep.mubr.f32.mxu0 %v1070_v50  ;;  %v858_v9 = vsub.f32 %v1917_v8, %v2466_v62  ;;  %v857_v13 = vsub.f32 %v1918_v11, %v2466_v62  ;;  %v892_v26 = vsub.f32 %v1919_v63, %v2481_v31  ;;  %v1920_v50 = vld [vmem:[#allocation2 + $0x140] sm:$0xff] }
 0x11b   : > { %v1860_v51 = vpop.eup %1859  ;;  %v728_v52 = vsub.f32 %v664_v44, %v696_v37  ;;  %v438_v5 = vpop.xlane.xlu1 %437  ;;  %v965_v55 = vmul.f32 %v1858_v46, %v2443_v41  ;;  %1282 = vmatmul.mubr.f32.gmra.mrb[4].mxu0 %v1069_v53  ;;  %1378 = vmatmul.mubr.f32.gmra.mrb[4].mxu1 %v1101_v0  ;;  %v964_v62 = vmul.f32 %v1858_v46, %v2440_v40 }
 0x11c   : > { %v776_v56 = vmax.f32 %v744_v49, 0.0  ;;  %v2525_v15 = vmul.f32 0.00390625, %v438_v5  ;;  %v390_v59 = vpop.xlane.xlu0 %389  ;;  %v933_v14 = vmul.f32 %v1860_v51, %v2443_v41  ;;  %v932_v12 = vmul.f32 %v1860_v51, %v2440_v40  ;;  %v1922_v5 = vld [vmem:[#allocation2 + $0x40] sm:$0xff] }
 0x11d   : > { %v760_v2 = vmax.f32 %v728_v52, 0.0  ;;  %v2530_v1 = vmul.f32 0.00390625, %v390_v59  ;;  %v1029_v4 = vmul.f32 %v965_v55, %v890_v48  ;;  %v1028_v37 = vmul.f32 %v964_v62, %v889_v3  ;;  %v1921_v52 = vld [vmem:[#allocation2 + $0x48] sm:$0xff] }
 0x11e   : > { %v808_v10 = vadd.f32 1e-05, %v776_v56  ;;  %v713_v18 = vmul.f32 %v2525_v15, %v2525_v15  ;;  %v997_v57 = vmul.f32 %v933_v14, %v858_v9  ;;  %v996_v25 = vmul.f32 %v932_v12, %v857_v13  ;;  %v1923_v9 = vld [vmem:[#allocation2 + $0x158] sm:$0xff] }
 0x11f   : > { %v792_v16 = vadd.f32 1e-05, %v760_v2  ;;  %v631_v19 = vpop.xlane.xlu1 %630  ;;  %v697_v6 = vmul.f32 %v2530_v1, %v2530_v1  ;;  %v1104_v23 = vadd.f32 %v2464_v61, %v1029_v4  ;;  %v1103_v47 = vadd.f32 %v2461_v60, %v1028_v37 }
 0x120   : > { %1865 = vrsqrt.f32 %v808_v10  ;;  %v681_v20 = vmul.f32 0.00390625, %v631_v19  ;;  %v583_v21 = vpop.xlane.xlu0 %582  ;;  %v1072_v28 = vadd.f32 %v2464_v61, %v997_v57  ;;  %v1071_v35 = vadd.f32 %v2461_v60, %v996_v25 }
 0x121   : > { %1867 = vrsqrt.f32 %v792_v16  ;;  %v665_v24 = vmul.f32 0.00390625, %v583_v21  ;;  %1383 = vmatprep.mubr.f32.mxu1 %v1104_v23  ;;  %v891_v51 = vsub.f32 %v1920_v50, %v2481_v31  ;;  %v860_v53 = vsub.f32 %v1921_v52, %v2485_v38 }
 0x122   : > { %v1862_v7 = vpop.eup %1861  ;;  %v745_v27 = vsub.f32 %v681_v20, %v713_v18  ;;  %1287 = vmatprep.mubr.f32.mxu0 %v1072_v28  ;;  %v859_v55 = vsub.f32 %v1922_v5, %v2485_v38  ;;  %1384 = vmatmul.mubr.f32.gmra.mrb[6].mxu1 %v1103_v47  ;;  %v894_v10 = vsub.f32 %v1923_v9, %v2505_v17  ;;  %v1924_v28 = vld [vmem:[#allocation2 + $0x150] sm:$0xff] }
 0x123   : > { %v1864_v33 = vpop.eup %1863  ;;  %v729_v34 = vsub.f32 %v665_v24, %v697_v6  ;;  %v441_v39 = vpop.xlane.xlu1 %440  ;;  %v967_v42 = vmul.f32 %v1862_v7, %v2443_v41  ;;  %1288 = vmatmul.mubr.f32.gmra.mrb[6].mxu0 %v1071_v35  ;;  %v966_v38 = vmul.f32 %v1862_v7, %v2440_v40 }
 0x124   : > { %v777_v32 = vmax.f32 %v745_v27, 0.0  ;;  %v2545_v43 = vmul.f32 0.00390625, %v441_v39  ;;  %v393_v44 = vpop.xlane.xlu0 %392  ;;  %v935_v45 = vmul.f32 %v1864_v33, %v2443_v41  ;;  %v934_v36 = vmul.f32 %v1864_v33, %v2440_v40  ;;  %v1926_v39 = vld [vmem:[#allocation2 + $0x50] sm:$0xff] }
 0x125   : > { %v761_v46 = vmax.f32 %v729_v34, 0.0  ;;  %v2550_v48 = vmul.f32 0.00390625, %v393_v44  ;;  %v1031_v49 = vmul.f32 %v967_v42, %v892_v26  ;;  %v1030_v6 = vmul.f32 %v966_v38, %v891_v51  ;;  %v1925_v34 = vld [vmem:[#allocation2 + $0x58] sm:$0xff] }
 0x126   : > { %v809_v54 = vadd.f32 1e-05, %v777_v32  ;;  %v714_v59 = vmul.f32 %v2545_v43, %v2545_v43  ;;  %v999_v31 = vmul.f32 %v935_v45, %v860_v53  ;;  %v998_v3 = vmul.f32 %v934_v36, %v859_v55  ;;  %v1927_v53 = vld [vmem:[#allocation2 + $0x168] sm:$0xff] }
 0x127   : > { %v793_v56 = vadd.f32 1e-05, %v761_v46  ;;  %v634_v14 = vpop.xlane.xlu1 %633  ;;  %v698_v12 = vmul.f32 %v2550_v48, %v2550_v48  ;;  %v1106_v4 = vadd.f32 %v2464_v61, %v1031_v49  ;;  %v1105_v63 = vadd.f32 %v2461_v60, %v1030_v6 }
 0x128   : > { %1869 = vrsqrt.f32 %v809_v54  ;;  %v682_v2 = vmul.f32 0.00390625, %v634_v14  ;;  %v586_v0 = vpop.xlane.xlu0 %585  ;;  %v1074_v13 = vadd.f32 %v2464_v61, %v999_v31  ;;  %v1073_v19 = vadd.f32 %v2461_v60, %v998_v3 }
 0x129   : > { %1871 = vrsqrt.f32 %v793_v56  ;;  %v666_v58 = vmul.f32 0.00390625, %v586_v0  ;;  %1389 = vmatprep.mubr.f32.mxu1 %v1106_v4  ;;  %v893_v33 = vsub.f32 %v1924_v28, %v2505_v17  ;;  %v862_v35 = vsub.f32 %v1925_v34, %v2510_v22 }
 0x12a   : > { %v1866_v8 = vpop.eup %1865  ;;  %v746_v11 = vsub.f32 %v682_v2, %v714_v59  ;;  %1293 = vmatprep.mubr.f32.mxu0 %v1074_v13  ;;  %v861_v42 = vsub.f32 %v1926_v39, %v2510_v22  ;;  %1390 = vmatmul.mubr.f32.gmra.mrb[8].mxu1 %v1105_v63  ;;  %v896_v54 = vsub.f32 %v1927_v53, %v2525_v15  ;;  %v1928_v13 = vld [vmem:[#allocation2 + $0x160] sm:$0xff] }
 0x12b   : > { %v1868_v16 = vpop.eup %1867  ;;  %v730_v18 = vsub.f32 %v666_v58, %v698_v12  ;;  %v444_v20 = vpop.xlane.xlu1 %443  ;;  %v969_v21 = vmul.f32 %v1866_v8, %v2443_v41  ;;  %1294 = vmatmul.mubr.f32.gmra.mrb[8].mxu0 %v1073_v19  ;;  %v968_v22 = vmul.f32 %v1866_v8, %v2440_v40 }
 0x12c   : > { %v778_v57 = vmax.f32 %v746_v11, 0.0  ;;  %v2565_v23 = vmul.f32 0.00390625, %v444_v20  ;;  %v396_v24 = vpop.xlane.xlu0 %395  ;;  %v937_v25 = vmul.f32 %v1868_v16, %v2443_v41  ;;  %v936_v62 = vmul.f32 %v1868_v16, %v2440_v40  ;;  %v1930_v20 = vld [vmem:[#allocation2 + $0x60] sm:$0xff] }
 0x12d   : > { %v762_v7 = vmax.f32 %v730_v18, 0.0  ;;  %v2570_v26 = vmul.f32 0.00390625, %v396_v24  ;;  %v1033_v27 = vmul.f32 %v969_v21, %v894_v10  ;;  %v1032_v12 = vmul.f32 %v968_v22, %v893_v33  ;;  %v1929_v18 = vld [vmem:[#allocation2 + $0x68] sm:$0xff] }
 0x12e   : > { %v810_v37 = vadd.f32 1e-05, %v778_v57  ;;  %v715_v44 = vmul.f32 %v2565_v23, %v2565_v23  ;;  %v1001_v17 = vmul.f32 %v937_v25, %v862_v35  ;;  %v1000_v51 = vmul.f32 %v936_v62, %v861_v42  ;;  %v1931_v35 = vld [vmem:[#allocation2 + $0x178] sm:$0xff] }
 0x12f   : > { %v794_v32 = vadd.f32 1e-05, %v762_v7  ;;  %v637_v45 = vpop.xlane.xlu1 %636  ;;  %v699_v36 = vmul.f32 %v2570_v26, %v2570_v26  ;;  %v1108_v49 = vadd.f32 %v2464_v61, %v1033_v27  ;;  %v1107_v9 = vadd.f32 %v2461_v60, %v1032_v12 }
 0x130   : > { %1873 = vrsqrt.f32 %v810_v37  ;;  %v683_v46 = vmul.f32 0.00390625, %v637_v45  ;;  %v589_v47 = vpop.xlane.xlu0 %588  ;;  %v1076_v55 = vadd.f32 %v2464_v61, %v1001_v17  ;;  %v1075_v14 = vadd.f32 %v2461_v60, %v1000_v51 }
 0x131   : > { %1875 = vrsqrt.f32 %v794_v32  ;;  %v667_v50 = vmul.f32 0.00390625, %v589_v47  ;;  %1395 = vmatprep.mubr.f32.mxu1 %v1108_v49  ;;  %v895_v16 = vsub.f32 %v1928_v13, %v2525_v15  ;;  %v864_v19 = vsub.f32 %v1929_v18, %v2530_v1 }
 0x132   : > { %v1870_v52 = vpop.eup %1869  ;;  %v747_v5 = vsub.f32 %v683_v46, %v715_v44  ;;  %1299 = vmatprep.mubr.f32.mxu0 %v1076_v55  ;;  %v863_v21 = vsub.f32 %v1930_v20, %v2530_v1  ;;  %1396 = vmatmul.mubr.f32.gmra.mrb[10].mxu1 %v1107_v9  ;;  %v898_v37 = vsub.f32 %v1931_v35, %v2545_v43  ;;  %v1932_v55 = vld [vmem:[#allocation2 + $0x170] sm:$0xff] }
 0x133   : > { %v1872_v56 = vpop.eup %1871  ;;  %v731_v59 = vsub.f32 %v667_v50, %v699_v36  ;;  %v447_v2 = vpop.xlane.xlu1 %446  ;;  %v971_v0 = vmul.f32 %v1870_v52, %v2443_v41  ;;  %1300 = vmatmul.mubr.f32.gmra.mrb[10].mxu0 %v1075_v14  ;;  %v970_v1 = vmul.f32 %v1870_v52, %v2440_v40 }
 0x134   : > { %v779_v31 = vmax.f32 %v747_v5, 0.0  ;;  %v2585_v4 = vmul.f32 0.00390625, %v447_v2  ;;  %v399_v58 = vpop.xlane.xlu0 %398  ;;  %v939_v3 = vmul.f32 %v1872_v56, %v2443_v41  ;;  %v938_v38 = vmul.f32 %v1872_v56, %v2440_v40  ;;  %v1934_v2 = vld [vmem:[#allocation2 + $0x70] sm:$0xff] }
 0x135   : > { %v763_v8 = vmax.f32 %v731_v59, 0.0  ;;  %v2590_v10 = vmul.f32 0.00390625, %v399_v58  ;;  %v1035_v11 = vmul.f32 %v971_v0, %v896_v54  ;;  %v1034_v36 = vmul.f32 %v970_v1, %v895_v16  ;;  %v1933_v59 = vld [vmem:[#allocation2 + $0x78] sm:$0xff] }
 0x136   : > { %v811_v6 = vadd.f32 1e-05, %v779_v31  ;;  %v716_v24 = vmul.f32 %v2585_v4, %v2585_v4  ;;  %v1003_v15 = vmul.f32 %v939_v3, %v864_v19  ;;  %v1002_v33 = vmul.f32 %v938_v38, %v863_v21  ;;  %v1935_v19 = vld [vmem:[#allocation2 + $0x188] sm:$0xff] }
 0x137   : > { %v795_v57 = vadd.f32 1e-05, %v763_v8  ;;  %v640_v25 = vpop.xlane.xlu1 %639  ;;  %v700_v62 = vmul.f32 %v2590_v10, %v2590_v10  ;;  %v1110_v27 = vadd.f32 %v2464_v61, %v1035_v11  ;;  %v1109_v53 = vadd.f32 %v2461_v60, %v1034_v36 }
 0x138   : > { %1877 = vrsqrt.f32 %v811_v6  ;;  %v684_v7 = vmul.f32 0.00390625, %v640_v25  ;;  %v592_v63 = vpop.xlane.xlu0 %591  ;;  %v1078_v42 = vadd.f32 %v2464_v61, %v1003_v15  ;;  %v1077_v45 = vadd.f32 %v2461_v60, %v1002_v33 }
 0x139   : > { %1879 = vrsqrt.f32 %v795_v57  ;;  %v668_v28 = vmul.f32 0.00390625, %v592_v63  ;;  %1401 = vmatprep.mubr.f32.mxu1 %v1110_v27  ;;  %v897_v56 = vsub.f32 %v1932_v55, %v2545_v43  ;;  %v866_v14 = vsub.f32 %v1933_v59, %v2550_v48 }
 0x13a   : > { %v1874_v34 = vpop.eup %1873  ;;  %v748_v39 = vsub.f32 %v684_v7, %v716_v24  ;;  %1305 = vmatprep.mubr.f32.mxu0 %v1078_v42  ;;  %v865_v0 = vsub.f32 %v1934_v2, %v2550_v48  ;;  %1402 = vmatmul.mubr.f32.gmra.mrb[12].mxu1 %v1109_v53  ;;  %v900_v6 = vsub.f32 %v1935_v19, %v2565_v23  ;;  %v1936_v42 = vld [vmem:[#allocation2 + $0x180] sm:$0xff] }
 0x13b   : > { %v1876_v32 = vpop.eup %1875  ;;  %v732_v44 = vsub.f32 %v668_v28, %v700_v62  ;;  %v450_v46 = vpop.xlane.xlu1 %449  ;;  %v973_v47 = vmul.f32 %v1874_v34, %v2443_v41  ;;  %1306 = vmatmul.mubr.f32.gmra.mrb[12].mxu0 %v1077_v45  ;;  %v972_v48 = vmul.f32 %v1874_v34, %v2440_v40 }
 0x13c   : > { %v780_v17 = vmax.f32 %v748_v39, 0.0  ;;  %v2605_v49 = vmul.f32 0.00390625, %v450_v46  ;;  %v402_v50 = vpop.xlane.xlu0 %401  ;;  %v941_v51 = vmul.f32 %v1876_v32, %v2443_v41  ;;  %v940_v22 = vmul.f32 %v1876_v32, %v2440_v40  ;;  %v1938_v46 = vld [vmem:[#allocation2 + $0x80] sm:$0xff] }
 0x13d   : > { %v764_v52 = vmax.f32 %v732_v44, 0.0  ;;  %v2610_v54 = vmul.f32 0.00390625, %v402_v50  ;;  %v1037_v5 = vmul.f32 %v973_v47, %v898_v37  ;;  %v1036_v62 = vmul.f32 %v972_v48, %v897_v56  ;;  %v1937_v44 = vld [vmem:[#allocation2 + $0x88] sm:$0xff] }
 0x13e   : > { %v812_v12 = vadd.f32 1e-05, %v780_v17  ;;  %v717_v58 = vmul.f32 %v2605_v49, %v2605_v49  ;;  %v1005_v43 = vmul.f32 %v941_v51, %v866_v14  ;;  %v1004_v16 = vmul.f32 %v940_v22, %v865_v0  ;;  %v1939_v14 = vld [vmem:[#allocation2 + $0x198] sm:$0xff] }
 0x13f   : > { %v796_v31 = vadd.f32 1e-05, %v764_v52  ;;  %v643_v3 = vpop.xlane.xlu1 %642  ;;  %v701_v38 = vmul.f32 %v2610_v54, %v2610_v54  ;;  %v1112_v11 = vadd.f32 %v2464_v61, %v1037_v5  ;;  %v1111_v35 = vadd.f32 %v2461_v60, %v1036_v62 }
 0x140   : > { %1881 = vrsqrt.f32 %v812_v12  ;;  %v685_v8 = vmul.f32 0.00390625, %v643_v3  ;;  %v595_v9 = vpop.xlane.xlu0 %594  ;;  %v1080_v21 = vadd.f32 %v2464_v61, %v1005_v43  ;;  %v1079_v25 = vadd.f32 %v2461_v60, %v1004_v16 }
 0x141   : > { %1883 = vrsqrt.f32 %v796_v31  ;;  %v669_v13 = vmul.f32 0.00390625, %v595_v9  ;;  %1407 = vmatprep.mubr.f32.mxu1 %v1112_v11  ;;  %v899_v32 = vsub.f32 %v1936_v42, %v2565_v23  ;;  %v868_v45 = vsub.f32 %v1937_v44, %v2570_v26 }
 0x142   : > { %v1878_v18 = vpop.eup %1877  ;;  %v749_v20 = vsub.f32 %v685_v8, %v717_v58  ;;  %1311 = vmatprep.mubr.f32.mxu0 %v1080_v21  ;;  %v867_v47 = vsub.f32 %v1938_v46, %v2570_v26  ;;  %1408 = vmatmul.mubr.f32.gmra.mrb[14].mxu1 %v1111_v35  ;;  %v902_v12 = vsub.f32 %v1939_v14, %v2585_v4  ;;  %v1940_v21 = vld [vmem:[#allocation2 + $0x190] sm:$0xff] }
 0x143   : > { %v1880_v57 = vpop.eup %1879  ;;  %v733_v24 = vsub.f32 %v669_v13, %v701_v38  ;;  %v453_v7 = vpop.xlane.xlu1 %452  ;;  %v975_v63 = vmul.f32 %v1878_v18, %v2443_v41  ;;  %1312 = vmatmul.mubr.f32.gmra.mrb[14].mxu0 %v1079_v25  ;;  %v974_v26 = vmul.f32 %v1878_v18, %v2440_v40 }
 0x144   : > { %v781_v15 = vmax.f32 %v749_v20, 0.0  ;;  %v2625_v27 = vmul.f32 0.00390625, %v453_v7  ;;  %v405_v28 = vpop.xlane.xlu0 %404  ;;  %v943_v33 = vmul.f32 %v1880_v57, %v2443_v41  ;;  %v942_v1 = vmul.f32 %v1880_v57, %v2440_v40  ;;  %v1942_v7 = vld [vmem:[#allocation2 + $0x90] sm:$0xff] }
 0x145   : > { %v765_v34 = vmax.f32 %v733_v24, 0.0  ;;  %v2630_v37 = vmul.f32 0.00390625, %v405_v28  ;;  %v1039_v39 = vmul.f32 %v975_v63, %v900_v6  ;;  %v1038_v38 = vmul.f32 %v974_v26, %v899_v32  ;;  %v1941_v24 = vld [vmem:[#allocation2 + $0x98] sm:$0xff] }
 0x146   : > { %v813_v36 = vadd.f32 1e-05, %v781_v15  ;;  %v718_v50 = vmul.f32 %v2625_v27, %v2625_v27  ;;  %v1007_v23 = vmul.f32 %v943_v33, %v868_v45  ;;  %v1006_v56 = vmul.f32 %v942_v1, %v867_v47  ;;  %v1943_v45 = vld [vmem:[#allocation2 + $0x1a8] sm:$0xff] }
 0x147   : > { %v797_v17 = vadd.f32 1e-05, %v765_v34  ;;  %v646_v51 = vpop.xlane.xlu1 %645  ;;  %v702_v22 = vmul.f32 %v2630_v37, %v2630_v37  ;;  %v1114_v5 = vadd.f32 %v2464_v61, %v1039_v39  ;;  %v1113_v19 = vadd.f32 %v2461_v60, %v1038_v38 }
 0x148   : > { %1885 = vrsqrt.f32 %v813_v36  ;;  %v686_v52 = vmul.f32 0.00390625, %v646_v51  ;;  %v598_v53 = vpop.xlane.xlu0 %597  ;;  %v1082_v0 = vadd.f32 %v2464_v61, %v1007_v23  ;;  %v1081_v3 = vadd.f32 %v2461_v60, %v1006_v56 }
 0x149   : > { %1887 = vrsqrt.f32 %v797_v17  ;;  %v670_v55 = vmul.f32 0.00390625, %v598_v53  ;;  %1413 = vmatprep.mubr.f32.mxu1 %v1114_v5  ;;  %v901_v57 = vsub.f32 %v1940_v21, %v2585_v4  ;;  %v870_v25 = vsub.f32 %v1941_v24, %v2590_v10 }
 0x14a   : > { %v1882_v59 = vpop.eup %1881  ;;  %v750_v2 = vsub.f32 %v686_v52, %v718_v50  ;;  %1317 = vmatprep.mubr.f32.mxu0 %v1082_v0  ;;  %v869_v63 = vsub.f32 %v1942_v7, %v2590_v10  ;;  %1414 = vmatmul.mubr.f32.gmra.mrb[16].mxu1 %v1113_v19  ;;  %v904_v36 = vsub.f32 %v1943_v45, %v2605_v49  ;;  %v1944_v0 = vld [vmem:[#allocation2 + $0x1a0] sm:$0xff] }
 0x14b   : > { %v1884_v31 = vpop.eup %1883  ;;  %v734_v58 = vsub.f32 %v670_v55, %v702_v22  ;;  %v456_v8 = vpop.xlane.xlu1 %455  ;;  %v977_v9 = vmul.f32 %v1882_v59, %v2443_v41  ;;  %1318 = vmatmul.mubr.f32.gmra.mrb[16].mxu0 %v1081_v3  ;;  %v976_v10 = vmul.f32 %v1882_v59, %v2440_v40 }
 0x14c   : > { %v782_v43 = vmax.f32 %v750_v2, 0.0  ;;  %v2645_v11 = vmul.f32 0.00390625, %v456_v8  ;;  %v408_v13 = vpop.xlane.xlu0 %407  ;;  %v945_v16 = vmul.f32 %v1884_v31, %v2443_v41  ;;  %v944_v48 = vmul.f32 %v1884_v31, %v2440_v40  ;;  %v1946_v8 = vld [vmem:[#allocation2 + $0xa0] sm:$0xff] }
 0x14d   : > { %v766_v18 = vmax.f32 %v734_v58, 0.0  ;;  %v2650_v6 = vmul.f32 0.00390625, %v408_v13  ;;  %v1041_v20 = vmul.f32 %v977_v9, %v902_v12  ;;  %v1040_v22 = vmul.f32 %v976_v10, %v901_v57  ;;  %v1945_v58 = vld [vmem:[#allocation2 + $0xa8] sm:$0xff] }
 0x14e   : > { %v814_v62 = vadd.f32 1e-05, %v782_v43  ;;  %v719_v28 = vmul.f32 %v2645_v11, %v2645_v11  ;;  %v1009_v4 = vmul.f32 %v945_v16, %v870_v25  ;;  %v1008_v32 = vmul.f32 %v944_v48, %v869_v63  ;;  %v1947_v25 = vld [vmem:[#allocation2 + $0x1b8] sm:$0xff] }
 0x14f   : > { %v798_v15 = vadd.f32 1e-05, %v766_v18  ;;  %v649_v33 = vpop.xlane.xlu1 %648  ;;  %v703_v1 = vmul.f32 %v2650_v6, %v2650_v6  ;;  %v1116_v39 = vadd.f32 %v2464_v61, %v1041_v20  ;;  %v1115_v14 = vadd.f32 %v2461_v60, %v1040_v22 }
 0x150   : > { %1889 = vrsqrt.f32 %v814_v62  ;;  %v687_v34 = vmul.f32 0.00390625, %v649_v33  ;;  %v601_v35 = vpop.xlane.xlu0 %600  ;;  %v1084_v47 = vadd.f32 %v2464_v61, %v1009_v4  ;;  %v1083_v51 = vadd.f32 %v2461_v60, %v1008_v32 }
 0x151   : > { %1891 = vrsqrt.f32 %v798_v15  ;;  %v671_v42 = vmul.f32 0.00390625, %v601_v35  ;;  %1419 = vmatprep.mubr.f32.mxu1 %v1116_v39  ;;  %v903_v31 = vsub.f32 %v1944_v0, %v2605_v49  ;;  %v872_v3 = vsub.f32 %v1945_v58, %v2610_v54 }
 0x152   : > { %v1886_v44 = vpop.eup %1885  ;;  %v751_v46 = vsub.f32 %v687_v34, %v719_v28  ;;  %1323 = vmatprep.mubr.f32.mxu0 %v1084_v47  ;;  %v871_v9 = vsub.f32 %v1946_v8, %v2610_v54  ;;  %1420 = vmatmul.mubr.f32.gmra.mrb[18].mxu1 %v1115_v14  ;;  %v906_v62 = vsub.f32 %v1947_v25, %v2625_v27  ;;  %v1948_v47 = vld [vmem:[#allocation2 + $0x1b0] sm:$0xff]  ;;  %v1952_v8 = vld [vmem:[#allocation2 + $0x1c8] sm:$0xff] }
 0x153   : > { %v1888_v17 = vpop.eup %1887  ;;  %v735_v50 = vsub.f32 %v671_v42, %v703_v1  ;;  %v459_v52 = vpop.xlane.xlu1 %458  ;;  %v979_v53 = vmul.f32 %v1886_v44, %v2443_v41  ;;  %1324 = vmatmul.mubr.f32.gmra.mrb[18].mxu0 %v1083_v51  ;;  %v978_v54 = vmul.f32 %v1886_v44, %v2440_v40 }
 0x154   : > { %v783_v23 = vmax.f32 %v751_v46, 0.0  ;;  %v2665_v5 = vmul.f32 0.00390625, %v459_v52  ;;  %v411_v55 = vpop.xlane.xlu0 %410  ;;  %v947_v56 = vmul.f32 %v1888_v17, %v2443_v41  ;;  %v946_v26 = vmul.f32 %v1888_v17, %v2440_v40  ;;  %v1950_v52 = vld [vmem:[#allocation2 + $0xb0] sm:$0xff] }
 0x155   : > { %v767_v59 = vmax.f32 %v735_v50, 0.0  ;;  %v2670_v12 = vmul.f32 0.00390625, %v411_v55  ;;  %v1043_v2 = vmul.f32 %v979_v53, %v904_v36  ;;  %v1042_v1 = vmul.f32 %v978_v54, %v903_v31  ;;  %v1949_v50 = vld [vmem:[#allocation2 + $0xb8] sm:$0xff] }
 0x156   : > { %v815_v38 = vadd.f32 1e-05, %v783_v23  ;;  %v720_v13 = vmul.f32 %v2665_v5, %v2665_v5  ;;  %v1011_v49 = vmul.f32 %v947_v56, %v872_v3  ;;  %v1010_v57 = vmul.f32 %v946_v26, %v871_v9  ;;  %v1951_v3 = vld [vmem:[#allocation2 + $0x1c0] sm:$0xff] }
 0x157   : > { %v799_v43 = vadd.f32 1e-05, %v767_v59  ;;  %v652_v16 = vpop.xlane.xlu1 %651  ;;  %v704_v48 = vmul.f32 %v2670_v12, %v2670_v12  ;;  %v1118_v20 = vadd.f32 %v2464_v61, %v1043_v2  ;;  %v1117_v45 = vadd.f32 %v2461_v60, %v1042_v1 }
 0x158   : > { %1893 = vrsqrt.f32 %v815_v38  ;;  %v688_v18 = vmul.f32 0.00390625, %v652_v16  ;;  %v604_v19 = vpop.xlane.xlu0 %603  ;;  %v1086_v63 = vadd.f32 %v2464_v61, %v1011_v49  ;;  %v1085_v33 = vadd.f32 %v2461_v60, %v1010_v57 }
 0x159   : > { %1895 = vrsqrt.f32 %v799_v43  ;;  %v672_v21 = vmul.f32 0.00390625, %v604_v19  ;;  %1425 = vmatprep.mubr.f32.mxu1 %v1118_v20  ;;  %v905_v17 = vsub.f32 %v1948_v47, %v2625_v27  ;;  %v874_v51 = vsub.f32 %v1949_v50, %v2630_v37 }
 0x15a   : > { %v1890_v24 = vpop.eup %1889  ;;  %v752_v7 = vsub.f32 %v688_v18, %v720_v13  ;;  %1329 = vmatprep.mubr.f32.mxu0 %v1086_v63  ;;  %v873_v53 = vsub.f32 %v1950_v52, %v2630_v37  ;;  %1426 = vmatmul.mubr.f32.gmra.mrb[20].mxu1 %v1117_v45  ;;  %v907_v38 = vsub.f32 %v1951_v3, %v2645_v11 }
 0x15b   : > { %v1892_v15 = vpop.eup %1891  ;;  %v736_v28 = vsub.f32 %v672_v21, %v704_v48  ;;  %v462_v34 = vpop.xlane.xlu1 %461  ;;  %v981_v35 = vmul.f32 %v1890_v24, %v2443_v41  ;;  %1330 = vmatmul.mubr.f32.gmra.mrb[20].mxu0 %v1085_v33  ;;  %v980_v37 = vmul.f32 %v1890_v24, %v2440_v40  ;;  %v908_v9 = vsub.f32 %v1952_v8, %v2645_v11  ;;  %v1954_v33 = vld [vmem:[#allocation2 + $0xc8] sm:$0xff] }
 0x15c   : > { %v784_v4 = vmax.f32 %v752_v7, 0.0  ;;  %v2685_v39 = vmul.f32 0.00390625, %v462_v34  ;;  %v414_v42 = vpop.xlane.xlu0 %413  ;;  %v949_v32 = vmul.f32 %v1892_v15, %v2443_v41  ;;  %v948_v10 = vmul.f32 %v1892_v15, %v2440_v40  ;;  %v1953_v15 = vld [vmem:[#allocation2 + $0xc0] sm:$0xff]  ;;  %v1955_v34 = vld [vmem:[#allocation2 + $0x1d0] sm:$0xff] }
 0x15d   : > { %v768_v44 = vmax.f32 %v736_v28, 0.0  ;;  %v2690_v36 = vmul.f32 0.00390625, %v414_v42  ;;  %v1045_v46 = vmul.f32 %v981_v35, %v906_v62  ;;  %v1044_v19 = vmul.f32 %v980_v37, %v905_v17  ;;  %v1956_v42 = vld [vmem:[#allocation2 + $0x1d8] sm:$0xff] }
 0x15e   : > { %v816_v22 = vadd.f32 1e-05, %v784_v4  ;;  %v721_v55 = vmul.f32 %v2685_v39, %v2685_v39  ;;  %v1013_v27 = vmul.f32 %v949_v32, %v874_v51  ;;  %v1012_v31 = vmul.f32 %v948_v10, %v873_v53  ;;  %v1957_v53 = vld [vmem:[#allocation2 + $0xd0] sm:$0xff] }
 0x15f   : > { %v800_v23 = vadd.f32 1e-05, %v768_v44  ;;  %v655_v56 = vpop.xlane.xlu1 %654  ;;  %v705_v26 = vmul.f32 %v2690_v36, %v2690_v36  ;;  %v1120_v2 = vadd.f32 %v2464_v61, %v1045_v46  ;;  %v1119_v62 = vadd.f32 %v2461_v60, %v1044_v19 }
 0x160   : > { %1897 = vrsqrt.f32 %v816_v22  ;;  %v689_v59 = vmul.f32 0.00390625, %v655_v56  ;;  %v607_v14 = vpop.xlane.xlu0 %606  ;;  %v1088_v13 = vadd.f32 %v2464_v61, %v1013_v27  ;;  %v1087_v18 = vadd.f32 %v2461_v60, %v1012_v31 }
 0x161   : > { %1899 = vrsqrt.f32 %v800_v23  ;;  %v673_v0 = vmul.f32 0.00390625, %v607_v14  ;;  %1431 = vmatprep.mubr.f32.mxu1 %v1120_v2  ;;  %v875_v28 = vsub.f32 %v1953_v15, %v2650_v6  ;;  %v876_v1 = vsub.f32 %v1954_v33, %v2650_v6  ;;  %v1961_v33 = vld [vmem:[#allocation2 + $0xe0] sm:$0xff] }
 0x162   : > { %v1894_v58 = vpop.eup %1893  ;;  %v753_v43 = vsub.f32 %v689_v59, %v721_v55  ;;  %1335 = vmatprep.mubr.f32.mxu0 %v1088_v13  ;;  %v909_v35 = vsub.f32 %v1955_v34, %v2665_v5  ;;  %v910_v32 = vsub.f32 %v1956_v42, %v2665_v5  ;;  %1432 = vmatmul.mubr.f32.gmra.mrb[22].mxu1 %v1119_v62  ;;  %v1958_v55 = vld [vmem:[#allocation2 + $0xd8] sm:$0xff]  ;;  %v1960_v62 = vld [vmem:[#allocation2 + $0x1e8] sm:$0xff] }
 0x163   : > { %v1896_v16 = vpop.eup %1895  ;;  %v737_v48 = vsub.f32 %v673_v0, %v705_v26  ;;  %v465_v49 = vpop.xlane.xlu1 %464  ;;  %v983_v20 = vmul.f32 %v1894_v58, %v2443_v41  ;;  %1336 = vmatmul.mubr.f32.gmra.mrb[22].mxu0 %v1087_v18  ;;  %v982_v5 = vmul.f32 %v1894_v58, %v2440_v40  ;;  %v877_v23 = vsub.f32 %v1957_v53, %v2670_v12  ;;  %v1962_v34 = vld [vmem:[#allocation2 + $0xe8] sm:$0xff] }
 0x164   : > { %v785_v21 = vmax.f32 %v753_v43, 0.0  ;;  %v2706_v57 = vmul.f32 0.00390625, %v465_v49  ;;  %v417_v54 = vpop.xlane.xlu0 %416  ;;  %v951_v24 = vmul.f32 %v1896_v16, %v2443_v41  ;;  %v950_v11 = vmul.f32 %v1896_v16, %v2440_v40 }
 0x165   : > { %v769_v25 = vmax.f32 %v737_v48, 0.0  ;;  %v2711_v7 = vmul.f32 0.00390625, %v417_v54  ;;  %v1047_v63 = vmul.f32 %v983_v20, %v908_v9  ;;  %v878_v56 = vsub.f32 %v1958_v55, %v2670_v12 }
 0x166   : > { %v817_v4 = vadd.f32 1e-05, %v785_v21  ;;  %v722_v44 = vmul.f32 %v2706_v57, %v2706_v57  ;;  %v1015_v6 = vmul.f32 %v951_v24, %v876_v1  ;;  %v1014_v22 = vmul.f32 %v950_v11, %v875_v28  ;;  %v1959_v24 = vld [vmem:[#allocation2 + $0x1e0] sm:$0xff] }
 0x167   : > { %v801_v10 = vadd.f32 1e-05, %v769_v25  ;;  %v658_v45 = vpop.xlane.xlu1 %657  ;;  %v706_v46 = vmul.f32 %v2711_v7, %v2711_v7  ;;  %v1122_v50 = vadd.f32 %v2464_v61, %v1047_v63  ;;  %v1046_v0 = vmul.f32 %v982_v5, %v907_v38 }
 0x168   : > { %1901 = vrsqrt.f32 %v817_v4  ;;  %v690_v47 = vmul.f32 0.00390625, %v658_v45  ;;  %v610_v17 = vpop.xlane.xlu0 %609  ;;  %v1090_v59 = vadd.f32 %v2464_v61, %v1015_v6  ;;  %v1089_v2 = vadd.f32 %v2461_v60, %v1014_v22  ;;  %v1964_v22 = vld [vmem:[#allocation2 + $0x1f8] sm:$0xff] }
 0x169   : > { %1903 = vrsqrt.f32 %v801_v10  ;;  %v674_v51 = vmul.f32 0.00390625, %v610_v17  ;;  %1437 = vmatprep.mubr.f32.mxu1 %v1122_v50  ;;  %v1121_v9 = vadd.f32 %v2461_v60, %v1046_v0  ;;  %v911_v11 = vsub.f32 %v1959_v24, %v2685_v39  ;;  %v1963_v50 = vld [vmem:[#allocation2 + $0x1f0] sm:$0xff] }
 0x16a   : > { %v1898_v52 = vpop.eup %1897  ;;  %v754_v26 = vsub.f32 %v690_v47, %v722_v44  ;;  %1341 = vmatprep.mubr.f32.mxu0 %v1090_v59  ;;  %v912_v63 = vsub.f32 %v1960_v62, %v2685_v39  ;;  %v879_v1 = vsub.f32 %v1961_v33, %v2690_v36  ;;  %v914_v5 = vsub.f32 %v1964_v22, %v2706_v57 }
 0x16b   : > { %v1900_v14 = vpop.eup %1899  ;;  %v738_v27 = vsub.f32 %v674_v51, %v706_v46  ;;  %v985_v31 = vmul.f32 %v1898_v52, %v2443_v41  ;;  %v984_v8 = vmul.f32 %v1898_v52, %v2440_v40  ;;  %1342 = vmatmul.mubr.f32.gmra.mrb[24].mxu0 %v1089_v2  ;;  %1438 = vmatmul.mubr.f32.gmra.mrb[24].mxu1 %v1121_v9 }
 0x16c   : > { %v786_v37 = vmax.f32 %v754_v26, 0.0  ;;  %v953_v58 = vmul.f32 %v1900_v14, %v2443_v41  ;;  %v952_v3 = vmul.f32 %v1900_v14, %v2440_v40  ;;  %v913_v51 = vsub.f32 %v1963_v50, %v2706_v57 }
 0x16d   : > { %v770_v12 = vmax.f32 %v738_v27, 0.0  ;;  %v1049_v43 = vmul.f32 %v985_v31, %v910_v32  ;;  %v1048_v18 = vmul.f32 %v984_v8, %v909_v35  ;;  %v880_v35 = vsub.f32 %v1962_v34, %v2690_v36 }
 0x16e   : > { %v818_v13 = vadd.f32 1e-05, %v786_v37  ;;  %v1017_v16 = vmul.f32 %v953_v58, %v878_v56  ;;  %v1016_v48 = vmul.f32 %v952_v3, %v877_v23  ;;  %v1965_v23 = vld [vmem:[#allocation2 + $0xf0] sm:$0xff]  ;;  %v1966_v56 = vld [vmem:[#allocation2 + $0xf8] sm:$0xff] }
 0x16f   : > { %v802_v38 = vadd.f32 1e-05, %v770_v12  ;;  %v1124_v19 = vadd.f32 %v2464_v61, %v1049_v43  ;;  %v1123_v21 = vadd.f32 %v2461_v60, %v1048_v18  ;;  %v881_v55 = vsub.f32 %v1965_v23, %v2711_v7 }
 0x170   : > { %1905 = vrsqrt.f32 %v818_v13  ;;  %v1092_v49 = vadd.f32 %v2464_v61, %v1017_v16  ;;  %v1091_v20 = vadd.f32 %v2461_v60, %v1016_v48  ;;  %v882_v26 = vsub.f32 %v1966_v56, %v2711_v7 }
 0x171   : > { %1907 = vrsqrt.f32 %v802_v38  ;;  %1443 = vmatprep.mubr.f32.mxu1 %v1124_v19 }
 0x172   : > { %v1902_v54 = vpop.eup %1901  ;;  %1347 = vmatprep.mubr.f32.mxu0 %v1092_v49  ;;  %1444 = vmatmul.mubr.f32.gmra.mrb[26].mxu1 %v1123_v21 }
 0x173   : > { %v1904_v25 = vpop.eup %1903  ;;  %1348 = vmatmul.mubr.f32.gmra.mrb[26].mxu0 %v1091_v20  ;;  %v987_v15 = vmul.f32 %v1902_v54, %v2443_v41  ;;  %v986_v28 = vmul.f32 %v1902_v54, %v2440_v40 }
 0x174   : > { %v955_v4 = vmul.f32 %v1904_v25, %v2443_v41  ;;  %v954_v42 = vmul.f32 %v1904_v25, %v2440_v40 }
 0x175   : > { %v1051_v32 = vmul.f32 %v987_v15, %v912_v63  ;;  %v1050_v10 = vmul.f32 %v986_v28, %v911_v11 }
 0x176   : > { %v1019_v44 = vmul.f32 %v955_v4, %v880_v35  ;;  %v1018_v39 = vmul.f32 %v954_v42, %v879_v1 }
 0x177   : > { %v1126_v45 = vadd.f32 %v2464_v61, %v1051_v32  ;;  %v1125_v46 = vadd.f32 %v2461_v60, %v1050_v10 }
 0x178   : > { %v1094_v47 = vadd.f32 %v2464_v61, %v1019_v44  ;;  %v1093_v17 = vadd.f32 %v2461_v60, %v1018_v39 }
 0x179   : > { %1449 = vmatprep.mubr.f32.mxu1 %v1126_v45 }
 0x17a   : > { %v1906_v6 = vpop.eup %1905  ;;  %1353 = vmatprep.mubr.f32.mxu0 %v1094_v47  ;;  %1450 = vmatmul.mubr.f32.gmra.mrb[28].mxu1 %v1125_v46 }
 0x17b   : > { %v1908_v36 = vpop.eup %1907  ;;  %1354 = vmatmul.mubr.f32.gmra.mrb[28].mxu0 %v1093_v17  ;;  %v989_v52 = vmul.f32 %v1906_v6, %v2443_v41  ;;  %v988_v53 = vmul.f32 %v1906_v6, %v2440_v40 }
 0x17c   : > { %v957_v59 = vmul.f32 %v1908_v36, %v2443_v41  ;;  %v956_v14 = vmul.f32 %v1908_v36, %v2440_v40  ;;  %v1193_v40 = vld [vmem:[%s300_s8] sm:$0x3] }
 0x17d   : > { %v1053_v27 = vmul.f32 %v989_v52, %v914_v5  ;;  %v1052_v2 = vmul.f32 %v988_v53, %v913_v51  ;;  %v2765_v41 = vrot.slane %v1193_v40, %v2428_v29 }
 0x17e   : > { %v1021_v0 = vmul.f32 %v957_v59, %v882_v26  ;;  %v1020_v57 = vmul.f32 %v956_v14, %v881_v55 }
 0x17f   : > { %v1128_v31 = vadd.f32 %v2464_v61, %v1053_v27  ;;  %v1127_v37 = vadd.f32 %v2461_v60, %v1052_v2 }
 0x180   : > { %v1096_v58 = vadd.f32 %v2464_v61, %v1021_v0  ;;  %v1095_v3 = vadd.f32 %v2461_v60, %v1020_v57  ;;  %v2768_v61 = vrot.slane %v1193_v40, %v2430_v30 }
 0x181   : > { %1455 = vmatprep.mubr.f32.mxu1 %v1128_v31 }
 0x182   : > { %1359 = vmatprep.mubr.f32.mxu0 %v1096_v58  ;;  %1456 = vmatmul.mubr.f32.gmra.mrb[30].mxu1 %v1127_v37 }
 0x183   : > { %1360 = vmatmul.mubr.f32.gmra.mrb[30].mxu0 %v1095_v3 }
 0x1dd   : > { %v1271_v60 = vpop.f32.mrb[0].mxu0 }
 0x1de   : > { %v1272_v7 = vadd.f32 %v1271_v60, %v2765_v41  ;;  %v1273_v8 = vpop.f32.mrb[1].mxu0 }
 0x1df   : > { %v1274_v12 = vadd.f32 %v1273_v8, %v2768_v61 }
 0x1e0   : > { %1462 = vst [vmem:[%s2774_s17] sm:$0xff] %v1272_v7 }
 0x1e1   : > { %1463 = vst [vmem:[%s2774_s17 + $0x8] sm:$0xff] %v1274_v12 }
 0x1e3   : > { %v1367_v29 = vpop.f32.mrb[0].mxu1 }
 0x1e4   : > { %v1368_v30 = vadd.f32 %v1367_v29, %v2765_v41  ;;  %v1369_v9 = vpop.f32.mrb[1].mxu1 }
 0x1e5   : > { %v1370_v43 = vadd.f32 %v1369_v9, %v2768_v61 }
 0x1e6   : > { %1494 = vst [vmem:[%s2774_s17 + $0x100] sm:$0xff] %v1368_v30  ;;  %v1277_v13 = vpop.f32.mrb[2].mxu0 }
 0x1e7   : > { %1495 = vst [vmem:[%s2774_s17 + $0x108] sm:$0xff] %v1370_v43  ;;  %v1278_v16 = vadd.f32 %v1277_v13, %v2765_v41  ;;  %v1279_v48 = vpop.f32.mrb[3].mxu0  ;;  %v1373_v18 = vpop.f32.mrb[2].mxu1 }
 0x1e8   : > { %v1280_v38 = vadd.f32 %v1279_v48, %v2768_v61  ;;  %v1374_v19 = vadd.f32 %v1373_v18, %v2765_v41  ;;  %v1375_v49 = vpop.f32.mrb[3].mxu1 }
 0x1e9   : > { %1464 = vst [vmem:[%s2774_s17 + $0x10] sm:$0xff] %v1278_v16  ;;  %v1376_v20 = vadd.f32 %v1375_v49, %v2768_v61 }
 0x1ea   : > { %1465 = vst [vmem:[%s2774_s17 + $0x18] sm:$0xff] %v1280_v38  ;;  %1496 = vst [vmem:[%s2774_s17 + $0x110] sm:$0xff] %v1374_v19 }
 0x1eb   : > { %1497 = vst [vmem:[%s2774_s17 + $0x118] sm:$0xff] %v1376_v20 }
 0x1ee   : > { %v1283_v21 = vpop.f32.mrb[4].mxu0  ;;  %v1379_v11 = vpop.f32.mrb[4].mxu1 }
 0x1ef   : > { %v1284_v54 = vadd.f32 %v1283_v21, %v2765_v41  ;;  %v1285_v24 = vpop.f32.mrb[5].mxu0  ;;  %v1380_v62 = vadd.f32 %v1379_v11, %v2765_v41  ;;  %v1381_v63 = vpop.f32.mrb[5].mxu1 }
 0x1f0   : > { %v1286_v25 = vadd.f32 %v1285_v24, %v2768_v61  ;;  %v1382_v15 = vadd.f32 %v1381_v63, %v2768_v61 }
 0x1f1   : > { %1466 = vst [vmem:[%s2774_s17 + $0x20] sm:$0xff] %v1284_v54  ;;  %1498 = vst [vmem:[%s2774_s17 + $0x120] sm:$0xff] %v1380_v62 }
 0x1f2   : > { %1467 = vst [vmem:[%s2774_s17 + $0x28] sm:$0xff] %v1286_v25  ;;  %1499 = vst [vmem:[%s2774_s17 + $0x128] sm:$0xff] %v1382_v15 }
 0x1f5   : > { %v1385_v34 = vpop.f32.mrb[6].mxu1 }
 0x1f6   : > { %v1289_v28 = vpop.f32.mrb[6].mxu0  ;;  %v1386_v4 = vadd.f32 %v1385_v34, %v2765_v41  ;;  %v1387_v42 = vpop.f32.mrb[7].mxu1 }
 0x1f7   : > { %v1290_v33 = vadd.f32 %v1289_v28, %v2765_v41  ;;  %v1291_v1 = vpop.f32.mrb[7].mxu0  ;;  %v1388_v32 = vadd.f32 %v1387_v42, %v2768_v61 }
 0x1f8   : > { %v1292_v35 = vadd.f32 %v1291_v1, %v2768_v61  ;;  %1500 = vst [vmem:[%s2774_s17 + $0x130] sm:$0xff] %v1386_v4 }
 0x1f9   : > { %1468 = vst [vmem:[%s2774_s17 + $0x30] sm:$0xff] %v1290_v33  ;;  %1501 = vst [vmem:[%s2774_s17 + $0x138] sm:$0xff] %v1388_v32 }
 0x1fa   : > { %1469 = vst [vmem:[%s2774_s17 + $0x38] sm:$0xff] %v1292_v35 }
 0x1fd   : > { %v1391_v45 = vpop.f32.mrb[8].mxu1 }
 0x1fe   : > { %v1295_v10 = vpop.f32.mrb[8].mxu0  ;;  %v1392_v47 = vadd.f32 %v1391_v45, %v2765_v41  ;;  %v1393_v17 = vpop.f32.mrb[9].mxu1 }
 0x1ff   : > { %v1296_v44 = vadd.f32 %v1295_v10, %v2765_v41  ;;  %v1297_v39 = vpop.f32.mrb[9].mxu0  ;;  %v1394_v6 = vadd.f32 %v1393_v17, %v2768_v61 }
 0x200   : > { %v1298_v46 = vadd.f32 %v1297_v39, %v2768_v61  ;;  %1502 = vst [vmem:[%s2774_s17 + $0x140] sm:$0xff] %v1392_v47 }
 0x201   : > { %1470 = vst [vmem:[%s2774_s17 + $0x40] sm:$0xff] %v1296_v44  ;;  %1503 = vst [vmem:[%s2774_s17 + $0x148] sm:$0xff] %v1394_v6 }
 0x202   : > { %1471 = vst [vmem:[%s2774_s17 + $0x48] sm:$0xff] %v1298_v46 }
 0x205   : > { %v1397_v22 = vpop.f32.mrb[10].mxu1 }
 0x206   : > { %v1301_v36 = vpop.f32.mrb[10].mxu0  ;;  %v1398_v52 = vadd.f32 %v1397_v22, %v2765_v41  ;;  %v1399_v53 = vpop.f32.mrb[11].mxu1 }
 0x207   : > { %v1302_v50 = vadd.f32 %v1301_v36, %v2765_v41  ;;  %v1303_v51 = vpop.f32.mrb[11].mxu0  ;;  %v1400_v23 = vadd.f32 %v1399_v53, %v2768_v61 }
 0x208   : > { %v1304_v5 = vadd.f32 %v1303_v51, %v2768_v61  ;;  %1504 = vst [vmem:[%s2774_s17 + $0x150] sm:$0xff] %v1398_v52 }
 0x209   : > { %1472 = vst [vmem:[%s2774_s17 + $0x50] sm:$0xff] %v1302_v50  ;;  %1505 = vst [vmem:[%s2774_s17 + $0x158] sm:$0xff] %v1400_v23 }
 0x20a   : > { %1473 = vst [vmem:[%s2774_s17 + $0x58] sm:$0xff] %v1304_v5 }
 0x20d   : > { %v1403_v59 = vpop.f32.mrb[12].mxu1 }
 0x20e   : > { %v1307_v55 = vpop.f32.mrb[12].mxu0  ;;  %v1404_v27 = vadd.f32 %v1403_v59, %v2765_v41  ;;  %v1405_v2 = vpop.f32.mrb[13].mxu1 }
 0x20f   : > { %v1308_v56 = vadd.f32 %v1307_v55, %v2765_v41  ;;  %v1309_v26 = vpop.f32.mrb[13].mxu0  ;;  %v1406_v0 = vadd.f32 %v1405_v2, %v2768_v61 }
 0x210   : > { %v1310_v14 = vadd.f32 %v1309_v26, %v2768_v61  ;;  %1506 = vst [vmem:[%s2774_s17 + $0x160] sm:$0xff] %v1404_v27 }
 0x211   : > { %1474 = vst [vmem:[%s2774_s17 + $0x60] sm:$0xff] %v1308_v56  ;;  %1507 = vst [vmem:[%s2774_s17 + $0x168] sm:$0xff] %v1406_v0 }
 0x212   : > { %1475 = vst [vmem:[%s2774_s17 + $0x68] sm:$0xff] %v1310_v14 }
 0x215   : > { %v1409_v58 = vpop.f32.mrb[14].mxu1 }
 0x216   : > { %v1313_v57 = vpop.f32.mrb[14].mxu0  ;;  %v1410_v40 = vadd.f32 %v1409_v58, %v2765_v41  ;;  %v1411_v60 = vpop.f32.mrb[15].mxu1 }
 0x217   : > { %v1314_v31 = vadd.f32 %v1313_v57, %v2765_v41  ;;  %v1315_v37 = vpop.f32.mrb[15].mxu0  ;;  %v1412_v7 = vadd.f32 %v1411_v60, %v2768_v61 }
 0x218   : > { %v1316_v3 = vadd.f32 %v1315_v37, %v2768_v61  ;;  %1508 = vst [vmem:[%s2774_s17 + $0x170] sm:$0xff] %v1410_v40 }
 0x219   : > { %1476 = vst [vmem:[%s2774_s17 + $0x70] sm:$0xff] %v1314_v31  ;;  %1509 = vst [vmem:[%s2774_s17 + $0x178] sm:$0xff] %v1412_v7 }
 0x21a   : > { %1477 = vst [vmem:[%s2774_s17 + $0x78] sm:$0xff] %v1316_v3 }
 0x21d   : > { %v1415_v30 = vpop.f32.mrb[16].mxu1 }
 0x21e   : > { %v1319_v8 = vpop.f32.mrb[16].mxu0  ;;  %v1416_v43 = vadd.f32 %v1415_v30, %v2765_v41  ;;  %v1417_v13 = vpop.f32.mrb[17].mxu1 }
 0x21f   : > { %v1320_v12 = vadd.f32 %v1319_v8, %v2765_v41  ;;  %v1321_v29 = vpop.f32.mrb[17].mxu0  ;;  %v1418_v16 = vadd.f32 %v1417_v13, %v2768_v61 }
 0x220   : > { %v1322_v9 = vadd.f32 %v1321_v29, %v2768_v61  ;;  %1510 = vst [vmem:[%s2774_s17 + $0x180] sm:$0xff] %v1416_v43 }
 0x221   : > { %1478 = vst [vmem:[%s2774_s17 + $0x80] sm:$0xff] %v1320_v12  ;;  %1511 = vst [vmem:[%s2774_s17 + $0x188] sm:$0xff] %v1418_v16 }
 0x222   : > { %1479 = vst [vmem:[%s2774_s17 + $0x88] sm:$0xff] %v1322_v9 }
 0x225   : > { %v1421_v19 = vpop.f32.mrb[18].mxu1 }
 0x226   : > { %v1325_v48 = vpop.f32.mrb[18].mxu0  ;;  %v1422_v20 = vadd.f32 %v1421_v19, %v2765_v41  ;;  %v1423_v21 = vpop.f32.mrb[19].mxu1 }
 0x227   : > { %v1326_v18 = vadd.f32 %v1325_v48, %v2765_v41  ;;  %v1327_v38 = vpop.f32.mrb[19].mxu0  ;;  %v1424_v54 = vadd.f32 %v1423_v21, %v2768_v61 }
 0x228   : > { %v1328_v49 = vadd.f32 %v1327_v38, %v2768_v61  ;;  %1512 = vst [vmem:[%s2774_s17 + $0x190] sm:$0xff] %v1422_v20 }
 0x229   : > { %1480 = vst [vmem:[%s2774_s17 + $0x90] sm:$0xff] %v1326_v18  ;;  %1513 = vst [vmem:[%s2774_s17 + $0x198] sm:$0xff] %v1424_v54 }
 0x22a   : > { %1481 = vst [vmem:[%s2774_s17 + $0x98] sm:$0xff] %v1328_v49 }
 0x22d   : > { %v1427_v62 = vpop.f32.mrb[20].mxu1 }
 0x22e   : > { %v1331_v24 = vpop.f32.mrb[20].mxu0  ;;  %v1428_v15 = vadd.f32 %v1427_v62, %v2765_v41  ;;  %v1429_v28 = vpop.f32.mrb[21].mxu1 }
 0x22f   : > { %v1332_v11 = vadd.f32 %v1331_v24, %v2765_v41  ;;  %v1333_v25 = vpop.f32.mrb[21].mxu0  ;;  %v1430_v33 = vadd.f32 %v1429_v28, %v2768_v61 }
 0x230   : > { %v1334_v63 = vadd.f32 %v1333_v25, %v2768_v61  ;;  %1514 = vst [vmem:[%s2774_s17 + $0x1a0] sm:$0xff] %v1428_v15 }
 0x231   : > { %1482 = vst [vmem:[%s2774_s17 + $0xa0] sm:$0xff] %v1332_v11  ;;  %1515 = vst [vmem:[%s2774_s17 + $0x1a8] sm:$0xff] %v1430_v33 }
 0x232   : > { %1483 = vst [vmem:[%s2774_s17 + $0xa8] sm:$0xff] %v1334_v63 }
 0x235   : > { %v1433_v4 = vpop.f32.mrb[22].mxu1 }
 0x236   : > { %v1337_v1 = vpop.f32.mrb[22].mxu0  ;;  %v1434_v32 = vadd.f32 %v1433_v4, %v2765_v41  ;;  %v1435_v10 = vpop.f32.mrb[23].mxu1 }
 0x237   : > { %v1338_v34 = vadd.f32 %v1337_v1, %v2765_v41  ;;  %v1339_v35 = vpop.f32.mrb[23].mxu0  ;;  %v1436_v44 = vadd.f32 %v1435_v10, %v2768_v61 }
 0x238   : > { %v1340_v42 = vadd.f32 %v1339_v35, %v2768_v61  ;;  %1516 = vst [vmem:[%s2774_s17 + $0x1b0] sm:$0xff] %v1434_v32 }
 0x239   : > { %1484 = vst [vmem:[%s2774_s17 + $0xb0] sm:$0xff] %v1338_v34  ;;  %1517 = vst [vmem:[%s2774_s17 + $0x1b8] sm:$0xff] %v1436_v44 }
 0x23a   : > { %1485 = vst [vmem:[%s2774_s17 + $0xb8] sm:$0xff] %v1340_v42 }
 0x23e   : > { %v1343_v39 = vpop.f32.mrb[24].mxu0  ;;  %v1439_v47 = vpop.f32.mrb[24].mxu1 }
 0x23f   : > { %v1344_v45 = vadd.f32 %v1343_v39, %v2765_v41  ;;  %v1345_v46 = vpop.f32.mrb[25].mxu0  ;;  %v1440_v6 = vadd.f32 %v1439_v47, %v2765_v41  ;;  %v1441_v36 = vpop.f32.mrb[25].mxu1 }
 0x240   : > { %v1346_v17 = vadd.f32 %v1345_v46, %v2768_v61  ;;  %v1442_v50 = vadd.f32 %v1441_v36, %v2768_v61 }
 0x241   : > { %1486 = vst [vmem:[%s2774_s17 + $0xc0] sm:$0xff] %v1344_v45  ;;  %1518 = vst [vmem:[%s2774_s17 + $0x1c0] sm:$0xff] %v1440_v6 }
 0x242   : > { %1487 = vst [vmem:[%s2774_s17 + $0xc8] sm:$0xff] %v1346_v17  ;;  %1519 = vst [vmem:[%s2774_s17 + $0x1c8] sm:$0xff] %v1442_v50 }
 0x245   : > { %v1445_v22 = vpop.f32.mrb[26].mxu1 }
 0x246   : > { %v1349_v51 = vpop.f32.mrb[26].mxu0  ;;  %v1446_v52 = vadd.f32 %v1445_v22, %v2765_v41  ;;  %v1447_v23 = vpop.f32.mrb[27].mxu1 }
 0x247   : > { %v1350_v5 = vadd.f32 %v1349_v51, %v2765_v41  ;;  %v1351_v53 = vpop.f32.mrb[27].mxu0  ;;  %v1448_v56 = vadd.f32 %v1447_v23, %v2768_v61 }
 0x248   : > { %v1352_v55 = vadd.f32 %v1351_v53, %v2768_v61  ;;  %1520 = vst [vmem:[%s2774_s17 + $0x1d0] sm:$0xff] %v1446_v52 }
 0x249   : > { %1488 = vst [vmem:[%s2774_s17 + $0xd0] sm:$0xff] %v1350_v5  ;;  %1521 = vst [vmem:[%s2774_s17 + $0x1d8] sm:$0xff] %v1448_v56 }
 0x24a   : > { %1489 = vst [vmem:[%s2774_s17 + $0xd8] sm:$0xff] %v1352_v55 }
 0x24d   : > { %v1451_v26 = vpop.f32.mrb[28].mxu1 }
 0x24e   : > { %v1355_v59 = vpop.f32.mrb[28].mxu0  ;;  %v1452_v14 = vadd.f32 %v1451_v26, %v2765_v41  ;;  %v1453_v27 = vpop.f32.mrb[29].mxu1 }
 0x24f   : > { %v1356_v2 = vadd.f32 %v1355_v59, %v2765_v41  ;;  %v1357_v0 = vpop.f32.mrb[29].mxu0  ;;  %v1454_v57 = vadd.f32 %v1453_v27, %v2768_v61 }
 0x250   : > { %1522 = vst [vmem:[%s2774_s17 + $0x1e0] sm:$0xff] %v1452_v14  ;;  %v1358_v31 = vadd.f32 %v1357_v0, %v2768_v61 }
 0x251   : > { %1490 = vst [vmem:[%s2774_s17 + $0xe0] sm:$0xff] %v1356_v2  ;;  %1523 = vst [vmem:[%s2774_s17 + $0x1e8] sm:$0xff] %v1454_v57 }
 0x252   : > { %1491 = vst [vmem:[%s2774_s17 + $0xe8] sm:$0xff] %v1358_v31 }
 0x255   : > { %v1457_v37 = vpop.f32.mrb[30].mxu1 }
 0x256   : > { %v1361_v58 = vpop.f32.mrb[30].mxu0  ;;  %v1458_v3 = vadd.f32 %v1457_v37, %v2765_v41  ;;  %v1459_v40 = vpop.f32.mrb[31].mxu1 }
 0x257   : > { %v1362_v60 = vadd.f32 %v1361_v58, %v2765_v41  ;;  %v1363_v7 = vpop.f32.mrb[31].mxu0  ;;  %v1460_v8 = vadd.f32 %v1459_v40, %v2768_v61 }
 0x258   : > { %1524 = vst [vmem:[%s2774_s17 + $0x1f0] sm:$0xff] %v1458_v3  ;;  %v1364_v12 = vadd.f32 %v1363_v7, %v2768_v61 }
 0x259   : > { %1492 = vst [vmem:[%s2774_s17 + $0xf0] sm:$0xff] %v1362_v60  ;;  %1525 = vst [vmem:[%s2774_s17 + $0x1f8] sm:$0xff] %v1460_v8 }
 0x25a   : > { %1493 = vst [vmem:[%s2774_s17 + $0xf8] sm:$0xff] %v1364_v12 }
 0x25b   : > { %2038 = shalt.err (!%p2035_p1)
}
 0x25c   : > { %s2039_s27 = scalar_lea.hbm %s2900_s25, 8192  ;;  %s2043_s15 = scalar_lea.hbm %s2962_s5, 24576 }
 0x25d   : > { %p2040_p5 = scmp.ne.s32.totalorder %s2900_s25, %s2039_s27  ;;  %p2044_p2 = scmp.lt.u32.totalorder %s2900_s25, %s2962_s5 }
 0x25e   : > { %p2045_p8 = scmp.lt.u32.totalorder %s2043_s15, %s2039_s27  ;;  %p2047_p11 = scmp.lt.u32.totalorder %s2039_s27, %s2900_s25 }
 0x25f   : > { %p2041_p7 = pnand %p2040_p5, %p2987_p4 }
 0x260   : > { %p2046_p9 = por %p2045_p8, %p2044_p2 }
 0x261   : > { %p2042_p12 = pneg %p2041_p7 }
 0x262   : > { %p2048_p13 = por %p2047_p11, %p2046_p9 }
 0x264   : > { %p2049_p0 = pnand %p2048_p13, %p2042_p12 }
 0x266   : > { %2052 = shalt.err (!%p2049_p0)
}
 0x267   : > { %s2119_s7 = smov 256   ;;  %s2120_s9 = smov 768  }
 0x268   : > { %s2121_s10 = smov 16  }
 0x269   : > { %1772 = dma.vmem_to_hbm [thread:$0]  (%p2987_p4), %s2904_s24, 8192, %s2900_s25, %s1527_s21, %s2119_s7, %s2120_s9, %s2121_s10  }
 0x26a PF: > { %s2988_s30 = sld [smem:[#allocation11_spill]]  ;;  %p1789_p10 = scmp.ge.s32.totalorder %s2111_s23, 2 }
 0x26b   : > { %s1558_s26 = sand.u32 1, %s2091_s18  }
 0x26c   : > { %s1559_s28 = scalar_lea.sflag [#allocation4], %s1558_s26 }
 0x270   : > { %p2989_p3 = scmp.ne.s32.totalorder %s2988_s30, 0 }
 0x272   : > { %p1783_p6 = pnand %p1789_p10, %p2989_p3 }
 0x274   : > { %2086 = dma.done.wait (!%p1783_p6), %s1559_s28, 8192  }
 0x275   : > { %2088 = vsyncadd (!%p1783_p6), %s1559_s28, 4294959104  ;;  %s22_s23 = sadd.s32 1, %s2111_s23   ;;  %s2990_s18 = smov %s2095_s19 }
 0x276   : > { %p19_p1 = scmp.ge.s32.totalorder %s22_s23, 5   ;;  %s2991_s19 = smov %s2099_s20 }
 0x277   : > { %s2992_s20 = smov %s2265_s13  ;;  %s2993_s21 = smov %s2107_s22 }
 0x278   : > { %s2994_s22 = smov %s2996_s11  ;;  %21 = sbr.rel (!%p19_p1) target bundleno = 7 (0x7), region = 94 }
 0x27f   :  { %1564 = vsyncpa [#allocation3], 1 }
 0x280   :  { %1566 = vsyncpa [#allocation3 + $0x1], 1 }
 0x281   :  { %1567 = vsyncpa [#allocation6], 1 }
 0x282   :  { %1569 = vsyncpa [#allocation6 + $0x1], 1 }
 0x283   :  { %1570 = vsyncpa [#allocation4], 1 }
 0x284   :  { %1572 = vsyncpa [#allocation4 + $0x1], 1 }

</bundles_post_ra>
